<compile_context>
chip_gen: v5e
topology: v5e:2x2
jax: 0.10.0
libtpu: 0.0.40
codegen_flags: <defaults>
</compile_context>

<pallas_src>
import functools

import jax
import jax.numpy as jnp
from jax.experimental import pallas as pl
from jax.experimental.pallas import tpu as pltpu


# ConvTranspose2d(k=4, s=2, p=1): output pixel (2h+dy, 2w+dx) receives exactly
# 2x2 kernel taps.  Along one axis, for phase d, tap j in {0,1} uses kernel
# index _K[d][j] and zero-padded-input row offset (d + 1 - j):
#   phase 0:  ky=1 -> padded h+1 ,  ky=3 -> padded h
#   phase 1:  ky=0 -> padded h+2 ,  ky=2 -> padded h+1
_K = ((1, 3), (0, 2))


def _upsample_kernel(x_ref, wp_ref, b_ref, o_ref, xcat_ref, *,
                     TH, W, C, T, weight_per_phase):
    """One (image, row-tile, output-row-phase) grid step."""
    t = pl.program_id(1)
    dy = pl.program_id(2)
    dt = x_ref.dtype

    # ---- build the column-unrolled, zero-padded row tile in VMEM ----------
    # xcat[r, w, s*C + c] == xpad[t*TH + r, w + s, c]  for s in {0, 1, 2},
    # where xpad is the (H+2, W+2, C) zero-padded NHWC image; every matmul
    # operand below is then a free leading-dim slice of xcat.
    # dy is the INNER "arbitrary" grid axis, so the scratch built at dy == 0
    # persists and is reused at dy == 1 of the same (image, row-tile).
    @pl.when(dy == 0)
    def _build():
        base = t * TH                            # first padded row of tile

        def put_rows(r0, nrows, src):
            # src: (nrows, W, C) input rows; write the three column shifts.
            zero_col = jnp.zeros((nrows, 1, C), dt)
            # s = 1 : xpad[., w+1] = x[., w]
            xcat_ref[r0:r0 + nrows, :, C:2 * C] = src
            # s = 0 : xpad[., w]   = x[., w-1]   (zero at w == 0)
            xcat_ref[r0:r0 + nrows, 0:1, 0:C] = zero_col
            xcat_ref[r0:r0 + nrows, 1:W, 0:C] = src[:, 0:W - 1, :]
            # s = 2 : xpad[., w+2] = x[., w+1]   (zero at w == W-1)
            xcat_ref[r0:r0 + nrows, W - 1:W, 2 * C:3 * C] = zero_col
            xcat_ref[r0:r0 + nrows, 0:W - 1, 2 * C:3 * C] = src[:, 1:W, :]

        # main body: xcat rows 1..TH  <-  input rows base..base+TH-1
        put_rows(1, TH, x_ref[0, pl.ds(base, TH), :, :])

        zero_row = jnp.zeros((1, W, 3 * C), dt)

        # top halo row: padded row `base` == input row base-1 (zero iff t==0)
        @pl.when(t == 0)
        def _():
            xcat_ref[0:1, :, :] = zero_row

        @pl.when(t > 0)
        def _():
            put_rows(0, 1, x_ref[0, pl.ds(base - 1, 1), :, :])

        # bottom halo row: padded row base+TH+1 == input row base+TH
        @pl.when(t == T - 1)
        def _():
            xcat_ref[TH + 1:TH + 2, :, :] = zero_row

        @pl.when(t < T - 1)
        def _():
            put_rows(TH + 1, 1, x_ref[0, pl.ds(base + TH, 1), :, :])

    # ---- two packed MXU matmuls (one per contributing kernel-row tap) -----
    # acc[h*W + w, dx*C + co] == output pixel (2*(t*TH+h)+dy, 2w+dx), chan co.
    # TODO(synk): when MXU-bound (C % 128 == 0, large C) split each packed
    # (HW,3C)@(3C,2C) matmul into two dense (HW,2C)@(2C,C) matmuls on lane
    # slices xcat[...,0:2C] / xcat[...,C:3C] to skip the structurally-zero
    # third of the packed weight.
    acc = None
    for j in range(2):
        oy = dy + 1 - j                          # row offset within xcat
        patch = xcat_ref[pl.ds(oy, TH), :, :].reshape(TH * W, 3 * C)
        w_j = wp_ref[0, j] if weight_per_phase else wp_ref[dy, j]
        prod = jnp.dot(patch, w_j, preferred_element_type=jnp.float32)
        acc = prod if acc is None else acc + prod
    acc = acc + b_ref[...]                       # (1, 2C) f32 bias, epilogue
    o_ref[0, 0] = acc.reshape(TH, W, 2 * C).astype(o_ref.dtype)


def _vmem_bytes(H, W, C, TH, cb, ob, weight_per_phase):
    """Rough per-step VMEM footprint (bytes) for the chosen tiling."""
    w_elems = (12 if weight_per_phase else 24) * C * C
    return (2 * H * W * C * cb             # full-image input block, 2 bufs
            + 2 * w_elems * cb             # packed weight block, 2 bufs
            + (TH + 2) * W * 3 * C * cb    # xcat scratch
            + TH * W * 2 * C * 4           # f32 accumulator
            + 2 * TH * W * 2 * C * ob)     # output block, 2 bufs


def upsample(x_nchw, weight, bias, *, compute_dtype=jnp.bfloat16,
             out_dtype=None, tile_h=None, weight_per_phase=None,
             vmem_budget_bytes=36 << 20):
    """ConvTranspose2d(dim, dim, 4, 2, 1) forward.  x_nchw: (N, C, H, W)."""
    N, C, H, W = x_nchw.shape
    assert weight.shape == (C, C, 4, 4) and bias.shape == (C,)
    out_dtype = x_nchw.dtype if out_dtype is None else out_dtype
    cb = jnp.dtype(compute_dtype).itemsize
    ob = jnp.dtype(out_dtype).itemsize

    # The in-kernel (TH, W, 3C) -> (TH*W, 3C) reshape is a free layout merge
    # only when W is a multiple of the dtype-packed sublane tile.
    sub = 8 * (4 // cb)
    if W % sub != 0:
        raise NotImplementedError(f"this kernel requires W % {sub} == 0")
    # NOTE: output stores are lane-dense only when 2*C >= 128 (C >= 64);
    # for smaller C the kernel is correct but uses masked partial stores.

    # Index the packed weight by the dy grid coordinate only when the full
    # resident weight (2 buffers) would eat real VMEM; for small C keep it
    # VMEM-resident with a constant index map (never re-DMA'd).
    if weight_per_phase is None:
        weight_per_phase = 2 * 24 * C * C * cb > (4 << 20)

    # Pick the largest row tile (divisor of H) whose footprint fits budget.
    if tile_h is None:
        divisors = [d for d in range(H, 0, -1) if H % d == 0]
        tile_h = divisors[-1]
        for d in divisors:
            if _vmem_bytes(H, W, C, d, cb, ob, weight_per_phase) <= vmem_budget_bytes:
                tile_h = d
                break
    if H % tile_h != 0:
        raise ValueError("tile_h must divide H")
    T = H // tile_h

    est = _vmem_bytes(H, W, C, tile_h, cb, ob, weight_per_phase)
    # v7x has only 64 MiB physical VMEM per TensorCore: cap the scoped limit
    # well below that, but never below what the blocks actually need.
    vmem_limit = min(50 << 20, max(32 << 20, int(1.5 * est) + (2 << 20)))
    vmem_limit = max(vmem_limit, est + (4 << 20))

    # NCHW -> NHWC (interface glue) fused with the compute-dtype cast; no
    # host-side zero padding (the halo is built inside the kernel).
    x_nhwc = jnp.transpose(x_nchw, (0, 2, 3, 1)).astype(compute_dtype)

    # Pack the 16 ConvTranspose taps into 4 block-sparse (3C, 2C) matrices,
    # one per (output-row phase dy, kernel-row tap j).  K axis = the three
    # column shifts s of the padded input, N axis = the two dx phases:
    #   rows  0:C   (s=0) -> dx=0 via kx=3
    #   rows  C:2C  (s=1) -> dx=0 via kx=1   and   dx=1 via kx=2
    #   rows 2C:3C  (s=2) -> dx=1 via kx=0
    wf = weight.astype(jnp.float32)               # (Cin, Cout, ky, kx)
    wp = jnp.zeros((2, 2, 3 * C, 2 * C), jnp.float32)
    for dy in range(2):
        for j in range(2):
            ky = _K[dy][j]
            wp = wp.at[dy, j, 0:C, 0:C].set(wf[:, :, ky, 3])
            wp = wp.at[dy, j, C:2 * C, 0:C].set(wf[:, :, ky, 1])
            wp = wp.at[dy, j, C:2 * C, C:2 * C].set(wf[:, :, ky, 2])
            wp = wp.at[dy, j, 2 * C:3 * C, C:2 * C].set(wf[:, :, ky, 0])
    wp = wp.astype(compute_dtype)
    # TODO(synk): if C % 128 != 0, pad C so the three xcat lane blocks and the
    # weight N dim land on 128-lane boundaries (avoids masked/relayout stores).
    b2 = jnp.tile(bias.astype(jnp.float32), 2).reshape(1, 2 * C)

    if weight_per_phase:
        wp_spec = pl.BlockSpec((1, 2, 3 * C, 2 * C),
                               lambda n, t, d: (d, 0, 0, 0))
    else:
        wp_spec = pl.BlockSpec((2, 2, 3 * C, 2 * C),
                               lambda n, t, d: (0, 0, 0, 0))

    kernel = functools.partial(_upsample_kernel, TH=tile_h, W=W, C=C, T=T,
                               weight_per_phase=weight_per_phase)
    out = pl.pallas_call(
        kernel,
        out_shape=jax.ShapeDtypeStruct((N, 2, H, W, 2 * C), out_dtype),
        grid_spec=pltpu.PrefetchScalarGridSpec(
            num_scalar_prefetch=0,
            grid=(N, T, 2),
            in_specs=[
                # whole image stays VMEM-resident across its (t, dy) steps
                # (block index only changes with n -> no re-DMA per tile).
                pl.BlockSpec((1, H, W, C), lambda n, t, d: (n, 0, 0, 0)),
                wp_spec,
                pl.BlockSpec((1, 2 * C), lambda n, t, d: (0, 0)),
            ],
            out_specs=pl.BlockSpec((1, 1, tile_h, W, 2 * C),
                                   lambda n, t, d: (n, d, t, 0, 0)),
            scratch_shapes=[pltpu.VMEM((tile_h + 2, W, 3 * C), compute_dtype)],
        ),
        compiler_params=pltpu.CompilerParams(
            # dy MUST stay the inner "arbitrary" axis: the xcat scratch built
            # at dy==0 is reused at dy==1 on the same core.
            dimension_semantics=("parallel", "parallel", "arbitrary"),
            vmem_limit_bytes=int(vmem_limit)),
    )(x_nhwc, wp, b2)

    # (N, 2, H, W, 2C) -> (N, C, 2H, 2W): the dx/dy phase interleave is a pure
    # reshape absorbed into the single interface-required layout transpose.
    # TODO(synk): skip this extra HBM pass when the consumer can take the
    # packed (N, 2, H, W, 2C) / NHWC layout directly.
    out = out.reshape(N, 2, H, W, 2, C)
    y = jnp.transpose(out, (0, 5, 2, 1, 3, 4))    # (n, c, h, dy, w, dx)
    return y.reshape(N, C, 2 * H, 2 * W)


def ref_conv_transpose(x_nchw, weight, bias):
    """Reference ConvTranspose2d(4, 2, 1) via lax.conv_general_dilated."""
    # equivalent forward conv: flip spatial taps, swap in/out channels,
    # dilate the input by 2, pad by k-1-p = 2.
    w_conv = jnp.flip(weight, axis=(2, 3)).transpose(1, 0, 2, 3)
    y = jax.lax.conv_general_dilated(
        x_nchw, w_conv, window_strides=(1, 1),
        padding=[(2, 2), (2, 2)], lhs_dilation=(2, 2),
        dimension_numbers=("NCHW", "OIHW", "NCHW"))
    return y + bias[None, :, None, None]


if __name__ == "__main__":
    N, dim, H, W = 2, 8, 16, 16
    key = jax.random.PRNGKey(0)
    k_w, k_b, k_x = jax.random.split(key, 3)

    # deterministic init mimicking PyTorch ConvTranspose2d default (uniform
    # with bound 1/sqrt(fan_in)); weight shape = (in_ch, out_ch, kH, kW)
    fan_in = dim * 4 * 4
    bound = 1.0 / (fan_in ** 0.5)
    weight = jax.random.uniform(k_w, (dim, dim, 4, 4), jnp.float32,
                                minval=-bound, maxval=bound)
    bias = jax.random.uniform(k_b, (dim,), jnp.float32,
                              minval=-bound, maxval=bound)
    x = jax.random.normal(k_x, (N, dim, H, W), jnp.float32)

    y_ref = ref_conv_transpose(x, weight, bias)

    # (1) auto tiling (single row tile at this size), resident packed weight.
    y1 = jax.block_until_ready(upsample(x, weight, bias))
    # (2) exercise the row-tiled grid (2 tiles, both halo paths) and the
    #     dy-indexed weight BlockSpec.
    y2 = jax.block_until_ready(
        upsample(x, weight, bias, tile_h=8, weight_per_phase=True))

    for y in (y1, y2):
        assert y.shape == (N, dim, 2 * H, 2 * W), y.shape
        # bf16 matmul operands (f32 accumulation) -> loosened tolerance vs
        # the all-f32 reference.
        max_err = float(jnp.max(jnp.abs(y - y_ref)))
        assert jnp.allclose(y, y_ref, atol=5e-2, rtol=5e-2), max_err

    print("KERNEL_OK")
</pallas_src>

<mosaic_0001>
module attributes {stable_mosaic.version = 11 : i64} {
  func.func @_upsample_kernel(%arg0: i32, %arg1: i32, %arg2: i32, %arg3: memref<1x16x16x8xbf16, #tpu.memory_space<vmem>>, %arg4: memref<2x2x24x16xbf16, #tpu.memory_space<vmem>>, %arg5: memref<1x16xf32, #tpu.memory_space<vmem>>, %arg6: memref<1x1x16x16x16xf32, #tpu.memory_space<vmem>>, %arg7: memref<18x16x24xbf16, #tpu.memory_space<vmem>>) attributes {dimension_semantics = [#tpu.dimension_semantics<parallel>, #tpu.dimension_semantics<parallel>, #tpu.dimension_semantics<arbitrary>], iteration_bounds = array<i64: 2, 1, 2>, scalar_prefetch = 0 : i64, scratch_operands = 1 : i64, tpu.core_type = #tpu.core_type<tc>, window_params = [{transform_indices = @transform_0, window_bounds = array<i64: 1, 16, 16, 8>}, {pipeline_mode = #tpu.pipeline_mode<synchronous>, transform_indices = @transform_1, window_bounds = array<i64: 2, 2, 24, 16>}, {pipeline_mode = #tpu.pipeline_mode<synchronous>, transform_indices = @transform_2, window_bounds = array<i64: 1, 16>}, {transform_indices = @transform_3, window_bounds = array<i64: 1, 1, 16, 16, 16>}]} {
    %c0_i32 = arith.constant 0 : i32
    %0 = arith.cmpi eq, %arg2, %c0_i32 : i32
    %1 = arith.extui %0 : i1 to i32
    %c0_i32_0 = arith.constant 0 : i32
    %2 = arith.cmpi ne, %1, %c0_i32_0 : i32
    scf.if %2 {
      %c16_i32 = arith.constant 16 : i32
      %29 = arith.muli %arg1, %c16_i32 : i32
      %c0_20 = arith.constant 0 : index
      %30 = arith.index_cast %29 : i32 to index
      %c0_21 = arith.constant 0 : index
      %c0_22 = arith.constant 0 : index
      %31 = vector.load %arg3[%c0_20, %30, %c0_21, %c0_22] : memref<1x16x16x8xbf16, #tpu.memory_space<vmem>>, vector<1x16x16x8xbf16>
      %32 = vector.shape_cast %31 : vector<1x16x16x8xbf16> to vector<16x16x8xbf16>
      %cst_23 = arith.constant 0.000000e+00 : bf16
      %33 = vector.broadcast %cst_23 : bf16 to vector<16x1x8xbf16>
      %c1_24 = arith.constant 1 : index
      %c0_25 = arith.constant 0 : index
      %c8 = arith.constant 8 : index
      %34 = vector.load %arg7[%c1_24, %c0_25, %c8] : memref<18x16x24xbf16, #tpu.memory_space<vmem>>, vector<16x16x8xbf16>
      tpu.vector_store %arg7[%c1_24, %c0_25, %c8], %32 {strides = array<i32>} : memref<18x16x24xbf16, #tpu.memory_space<vmem>>, vector<16x16x8xbf16>,
      %c1_26 = arith.constant 1 : index
      %c0_27 = arith.constant 0 : index
      %c0_28 = arith.constant 0 : index
      %35 = vector.load %arg7[%c1_26, %c0_27, %c0_28] : memref<18x16x24xbf16, #tpu.memory_space<vmem>>, vector<16x1x8xbf16>
      tpu.vector_store %arg7[%c1_26, %c0_27, %c0_28], %33 {strides = array<i32>} : memref<18x16x24xbf16, #tpu.memory_space<vmem>>, vector<16x1x8xbf16>,
      %36 = vector.extract_strided_slice %32 {offsets = [0, 0, 0], sizes = [16, 15, 8], strides = [1, 1, 1]} : vector<16x16x8xbf16> to vector<16x15x8xbf16>
      %c1_29 = arith.constant 1 : index
      %c1_30 = arith.constant 1 : index
      %c0_31 = arith.constant 0 : index
      %37 = vector.load %arg7[%c1_29, %c1_30, %c0_31] : memref<18x16x24xbf16, #tpu.memory_space<vmem>>, vector<16x15x8xbf16>
      tpu.vector_store %arg7[%c1_29, %c1_30, %c0_31], %36 {strides = array<i32>} : memref<18x16x24xbf16, #tpu.memory_space<vmem>>, vector<16x15x8xbf16>,
      %c1_32 = arith.constant 1 : index
      %c15 = arith.constant 15 : index
      %c16 = arith.constant 16 : index
      %38 = vector.load %arg7[%c1_32, %c15, %c16] : memref<18x16x24xbf16, #tpu.memory_space<vmem>>, vector<16x1x8xbf16>
      tpu.vector_store %arg7[%c1_32, %c15, %c16], %33 {strides = array<i32>} : memref<18x16x24xbf16, #tpu.memory_space<vmem>>, vector<16x1x8xbf16>,
      %39 = vector.extract_strided_slice %32 {offsets = [0, 1, 0], sizes = [16, 15, 8], strides = [1, 1, 1]} : vector<16x16x8xbf16> to vector<16x15x8xbf16>
      %c1_33 = arith.constant 1 : index
      %c0_34 = arith.constant 0 : index
      %c16_35 = arith.constant 16 : index
      %40 = vector.load %arg7[%c1_33, %c0_34, %c16_35] : memref<18x16x24xbf16, #tpu.memory_space<vmem>>, vector<16x15x8xbf16>
      tpu.vector_store %arg7[%c1_33, %c0_34, %c16_35], %39 {strides = array<i32>} : memref<18x16x24xbf16, #tpu.memory_space<vmem>>, vector<16x15x8xbf16>,
      %cst_36 = arith.constant 0.000000e+00 : bf16
      %41 = vector.broadcast %cst_36 : bf16 to vector<1x16x24xbf16>
      %c0_i32_37 = arith.constant 0 : i32
      %42 = arith.cmpi eq, %arg1, %c0_i32_37 : i32
      %43 = arith.extui %42 : i1 to i32
      %c0_i32_38 = arith.constant 0 : i32
      %44 = arith.cmpi ne, %43, %c0_i32_38 : i32
      scf.if %44 {
        %c0_45 = arith.constant 0 : index
        %c0_46 = arith.constant 0 : index
        %c0_47 = arith.constant 0 : index
        %54 = vector.load %arg7[%c0_45, %c0_46, %c0_47] : memref<18x16x24xbf16, #tpu.memory_space<vmem>>, vector<1x16x24xbf16>
        tpu.vector_store %arg7[%c0_45, %c0_46, %c0_47], %41 {strides = array<i32>} : memref<18x16x24xbf16, #tpu.memory_space<vmem>>, vector<1x16x24xbf16>,
      } else {
      }
      %c0_i32_39 = arith.constant 0 : i32
      %45 = arith.cmpi sgt, %arg1, %c0_i32_39 : i32
      %46 = arith.extui %45 : i1 to i32
      %c0_i32_40 = arith.constant 0 : i32
      %47 = arith.cmpi ne, %46, %c0_i32_40 : i32
      scf.if %47 {
        %c1_i32_45 = arith.constant 1 : i32
        %54 = arith.subi %29, %c1_i32_45 : i32
        %c0_46 = arith.constant 0 : index
        %55 = arith.index_cast %54 : i32 to index
        %c0_47 = arith.constant 0 : index
        %c0_48 = arith.constant 0 : index
        %56 = vector.load %arg3[%c0_46, %55, %c0_47, %c0_48] : memref<1x16x16x8xbf16, #tpu.memory_space<vmem>>, vector<1x1x16x8xbf16>
        %57 = vector.shape_cast %56 : vector<1x1x16x8xbf16> to vector<1x16x8xbf16>
        %cst_49 = arith.constant 0.000000e+00 : bf16
        %58 = vector.broadcast %cst_49 : bf16 to vector<1x1x8xbf16>
        %c0_50 = arith.constant 0 : index
        %c0_51 = arith.constant 0 : index
        %c8_52 = arith.constant 8 : index
        %59 = vector.load %arg7[%c0_50, %c0_51, %c8_52] : memref<18x16x24xbf16, #tpu.memory_space<vmem>>, vector<1x16x8xbf16>
        tpu.vector_store %arg7[%c0_50, %c0_51, %c8_52], %57 {strides = array<i32>} : memref<18x16x24xbf16, #tpu.memory_space<vmem>>, vector<1x16x8xbf16>,
        %c0_53 = arith.constant 0 : index
        %c0_54 = arith.constant 0 : index
        %c0_55 = arith.constant 0 : index
        %60 = vector.load %arg7[%c0_53, %c0_54, %c0_55] : memref<18x16x24xbf16, #tpu.memory_space<vmem>>, vector<1x1x8xbf16>
        tpu.vector_store %arg7[%c0_53, %c0_54, %c0_55], %58 {strides = array<i32>} : memref<18x16x24xbf16, #tpu.memory_space<vmem>>, vector<1x1x8xbf16>,
        %61 = vector.extract_strided_slice %57 {offsets = [0, 0, 0], sizes = [1, 15, 8], strides = [1, 1, 1]} : vector<1x16x8xbf16> to vector<1x15x8xbf16>
        %c0_56 = arith.constant 0 : index
        %c1_57 = arith.constant 1 : index
        %c0_58 = arith.constant 0 : index
        %62 = vector.load %arg7[%c0_56, %c1_57, %c0_58] : memref<18x16x24xbf16, #tpu.memory_space<vmem>>, vector<1x15x8xbf16>
        tpu.vector_store %arg7[%c0_56, %c1_57, %c0_58], %61 {strides = array<i32>} : memref<18x16x24xbf16, #tpu.memory_space<vmem>>, vector<1x15x8xbf16>,
        %c0_59 = arith.constant 0 : index
        %c15_60 = arith.constant 15 : index
        %c16_61 = arith.constant 16 : index
        %63 = vector.load %arg7[%c0_59, %c15_60, %c16_61] : memref<18x16x24xbf16, #tpu.memory_space<vmem>>, vector<1x1x8xbf16>
        tpu.vector_store %arg7[%c0_59, %c15_60, %c16_61], %58 {strides = array<i32>} : memref<18x16x24xbf16, #tpu.memory_space<vmem>>, vector<1x1x8xbf16>,
        %64 = vector.extract_strided_slice %57 {offsets = [0, 1, 0], sizes = [1, 15, 8], strides = [1, 1, 1]} : vector<1x16x8xbf16> to vector<1x15x8xbf16>
        %c0_62 = arith.constant 0 : index
        %c0_63 = arith.constant 0 : index
        %c16_64 = arith.constant 16 : index
        %65 = vector.load %arg7[%c0_62, %c0_63, %c16_64] : memref<18x16x24xbf16, #tpu.memory_space<vmem>>, vector<1x15x8xbf16>
        tpu.vector_store %arg7[%c0_62, %c0_63, %c16_64], %64 {strides = array<i32>} : memref<18x16x24xbf16, #tpu.memory_space<vmem>>, vector<1x15x8xbf16>,
      } else {
      }
      %c0_i32_41 = arith.constant 0 : i32
      %48 = arith.cmpi eq, %arg1, %c0_i32_41 : i32
      %49 = arith.extui %48 : i1 to i32
      %c0_i32_42 = arith.constant 0 : i32
      %50 = arith.cmpi ne, %49, %c0_i32_42 : i32
      scf.if %50 {
        %c17 = arith.constant 17 : index
        %c0_45 = arith.constant 0 : index
        %c0_46 = arith.constant 0 : index
        %54 = vector.load %arg7[%c17, %c0_45, %c0_46] : memref<18x16x24xbf16, #tpu.memory_space<vmem>>, vector<1x16x24xbf16>
        tpu.vector_store %arg7[%c17, %c0_45, %c0_46], %41 {strides = array<i32>} : memref<18x16x24xbf16, #tpu.memory_space<vmem>>, vector<1x16x24xbf16>,
      } else {
      }
      %c0_i32_43 = arith.constant 0 : i32
      %51 = arith.cmpi slt, %arg1, %c0_i32_43 : i32
      %52 = arith.extui %51 : i1 to i32
      %c0_i32_44 = arith.constant 0 : i32
      %53 = arith.cmpi ne, %52, %c0_i32_44 : i32
      scf.if %53 {
        %c16_i32_45 = arith.constant 16 : i32
        %54 = arith.addi %29, %c16_i32_45 : i32
        %c0_46 = arith.constant 0 : index
        %55 = arith.index_cast %54 : i32 to index
        %c0_47 = arith.constant 0 : index
        %c0_48 = arith.constant 0 : index
        %56 = vector.load %arg3[%c0_46, %55, %c0_47, %c0_48] : memref<1x16x16x8xbf16, #tpu.memory_space<vmem>>, vector<1x1x16x8xbf16>
        %57 = vector.shape_cast %56 : vector<1x1x16x8xbf16> to vector<1x16x8xbf16>
        %cst_49 = arith.constant 0.000000e+00 : bf16
        %58 = vector.broadcast %cst_49 : bf16 to vector<1x1x8xbf16>
        %c17 = arith.constant 17 : index
        %c0_50 = arith.constant 0 : index
        %c8_51 = arith.constant 8 : index
        %59 = vector.load %arg7[%c17, %c0_50, %c8_51] : memref<18x16x24xbf16, #tpu.memory_space<vmem>>, vector<1x16x8xbf16>
        tpu.vector_store %arg7[%c17, %c0_50, %c8_51], %57 {strides = array<i32>} : memref<18x16x24xbf16, #tpu.memory_space<vmem>>, vector<1x16x8xbf16>,
        %c17_52 = arith.constant 17 : index
        %c0_53 = arith.constant 0 : index
        %c0_54 = arith.constant 0 : index
        %60 = vector.load %arg7[%c17_52, %c0_53, %c0_54] : memref<18x16x24xbf16, #tpu.memory_space<vmem>>, vector<1x1x8xbf16>
        tpu.vector_store %arg7[%c17_52, %c0_53, %c0_54], %58 {strides = array<i32>} : memref<18x16x24xbf16, #tpu.memory_space<vmem>>, vector<1x1x8xbf16>,
        %61 = vector.extract_strided_slice %57 {offsets = [0, 0, 0], sizes = [1, 15, 8], strides = [1, 1, 1]} : vector<1x16x8xbf16> to vector<1x15x8xbf16>
        %c17_55 = arith.constant 17 : index
        %c1_56 = arith.constant 1 : index
        %c0_57 = arith.constant 0 : index
        %62 = vector.load %arg7[%c17_55, %c1_56, %c0_57] : memref<18x16x24xbf16, #tpu.memory_space<vmem>>, vector<1x15x8xbf16>
        tpu.vector_store %arg7[%c17_55, %c1_56, %c0_57], %61 {strides = array<i32>} : memref<18x16x24xbf16, #tpu.memory_space<vmem>>, vector<1x15x8xbf16>,
        %c17_58 = arith.constant 17 : index
        %c15_59 = arith.constant 15 : index
        %c16_60 = arith.constant 16 : index
        %63 = vector.load %arg7[%c17_58, %c15_59, %c16_60] : memref<18x16x24xbf16, #tpu.memory_space<vmem>>, vector<1x1x8xbf16>
        tpu.vector_store %arg7[%c17_58, %c15_59, %c16_60], %58 {strides = array<i32>} : memref<18x16x24xbf16, #tpu.memory_space<vmem>>, vector<1x1x8xbf16>,
        %64 = vector.extract_strided_slice %57 {offsets = [0, 1, 0], sizes = [1, 15, 8], strides = [1, 1, 1]} : vector<1x16x8xbf16> to vector<1x15x8xbf16>
        %c17_61 = arith.constant 17 : index
        %c0_62 = arith.constant 0 : index
        %c16_63 = arith.constant 16 : index
        %65 = vector.load %arg7[%c17_61, %c0_62, %c16_63] : memref<18x16x24xbf16, #tpu.memory_space<vmem>>, vector<1x15x8xbf16>
        tpu.vector_store %arg7[%c17_61, %c0_62, %c16_63], %64 {strides = array<i32>} : memref<18x16x24xbf16, #tpu.memory_space<vmem>>, vector<1x15x8xbf16>,
      } else {
      }
    } else {
    }
    %c1_i32 = arith.constant 1 : i32
    %3 = arith.addi %arg2, %c1_i32 : i32
    %c0_i32_1 = arith.constant 0 : i32
    %4 = arith.subi %3, %c0_i32_1 : i32
    %5 = arith.index_cast %4 : i32 to index
    %c0 = arith.constant 0 : index
    %c0_2 = arith.constant 0 : index
    %6 = vector.load %arg7[%5, %c0, %c0_2] : memref<18x16x24xbf16, #tpu.memory_space<vmem>>, vector<16x16x24xbf16>
    %7 = vector.shape_cast %6 : vector<16x16x24xbf16> to vector<256x24xbf16>
    %8 = arith.index_cast %arg2 : i32 to index
    %c0_3 = arith.constant 0 : index
    %c0_4 = arith.constant 0 : index
    %c0_5 = arith.constant 0 : index
    %9 = vector.load %arg4[%8, %c0_3, %c0_4, %c0_5] : memref<2x2x24x16xbf16, #tpu.memory_space<vmem>>, vector<1x1x24x16xbf16>
    %10 = vector.shape_cast %9 : vector<1x1x24x16xbf16> to vector<24x16xbf16>
    %cst = arith.constant dense<0.000000e+00> : vector<256x16xf32>
    %11 = tpu.matmul %7, %10, %cst {dimension_numbers = #tpu.dot_dimension_numbers<[1], [0], [0], [1], [0, 0, 1, 1], [], []>} : vector<256x24xbf16>, vector<24x16xbf16>, vector<256x16xf32> -> vector<256x16xf32>
    %c1_i32_6 = arith.constant 1 : i32
    %12 = arith.addi %arg2, %c1_i32_6 : i32
    %c1_i32_7 = arith.constant 1 : i32
    %13 = arith.subi %12, %c1_i32_7 : i32
    %14 = arith.index_cast %13 : i32 to index
    %c0_8 = arith.constant 0 : index
    %c0_9 = arith.constant 0 : index
    %15 = vector.load %arg7[%14, %c0_8, %c0_9] : memref<18x16x24xbf16, #tpu.memory_space<vmem>>, vector<16x16x24xbf16>
    %16 = vector.shape_cast %15 : vector<16x16x24xbf16> to vector<256x24xbf16>
    %17 = arith.index_cast %arg2 : i32 to index
    %c1 = arith.constant 1 : index
    %c0_10 = arith.constant 0 : index
    %c0_11 = arith.constant 0 : index
    %18 = vector.load %arg4[%17, %c1, %c0_10, %c0_11] : memref<2x2x24x16xbf16, #tpu.memory_space<vmem>>, vector<1x1x24x16xbf16>
    %19 = vector.shape_cast %18 : vector<1x1x24x16xbf16> to vector<24x16xbf16>
    %cst_12 = arith.constant dense<0.000000e+00> : vector<256x16xf32>
    %20 = tpu.matmul %16, %19, %cst_12 {dimension_numbers = #tpu.dot_dimension_numbers<[1], [0], [0], [1], [0, 0, 1, 1], [], []>} : vector<256x24xbf16>, vector<24x16xbf16>, vector<256x16xf32> -> vector<256x16xf32>
    %21 = arith.addf %11, %20 : vector<256x16xf32>
    %c0_13 = arith.constant 0 : index
    %c0_14 = arith.constant 0 : index
    %22 = vector.load %arg5[%c0_13, %c0_14] : memref<1x16xf32, #tpu.memory_space<vmem>>, vector<1x16xf32>
    %23 = vector.broadcast %22 : vector<1x16xf32> to vector<256x16xf32>
    %24 = arith.addf %21, %23 : vector<256x16xf32>
    %25 = vector.shape_cast %24 : vector<256x16xf32> to vector<16x16x16xf32>
    %c0_15 = arith.constant 0 : index
    %c0_16 = arith.constant 0 : index
    %c0_17 = arith.constant 0 : index
    %c0_18 = arith.constant 0 : index
    %c0_19 = arith.constant 0 : index
    %26 = vector.load %arg6[%c0_15, %c0_16, %c0_17, %c0_18, %c0_19] : memref<1x1x16x16x16xf32, #tpu.memory_space<vmem>>, vector<1x1x16x16x16xf32>
    %27 = vector.shape_cast %26 : vector<1x1x16x16x16xf32> to vector<16x16x16xf32>
    %28 = vector.shape_cast %25 : vector<16x16x16xf32> to vector<1x1x16x16x16xf32>
    tpu.vector_store %arg6[%c0_15, %c0_16, %c0_17, %c0_18, %c0_19], %28 {strides = array<i32>} : memref<1x1x16x16x16xf32, #tpu.memory_space<vmem>>, vector<1x1x16x16x16xf32>,
    return
  }
  func.func @transform_0(%arg0: i32, %arg1: i32, %arg2: i32) -> (i32, i32, i32, i32) {
    %c0_i32 = arith.constant 0 : i32
    %c0_i32_0 = arith.constant 0 : i32
    %c0_i32_1 = arith.constant 0 : i32
    %c0_i32_2 = arith.constant 0 : i32
    return %arg0, %c0_i32, %c0_i32_0, %c0_i32_1 : i32, i32, i32, i32
  }
  func.func @transform_1(%arg0: i32, %arg1: i32, %arg2: i32) -> (i32, i32, i32, i32) {
    %c0_i32 = arith.constant 0 : i32
    %c0_i32_0 = arith.constant 0 : i32
    %c0_i32_1 = arith.constant 0 : i32
    %c0_i32_2 = arith.constant 0 : i32
    %c0_i32_3 = arith.constant 0 : i32
    return %c0_i32, %c0_i32_0, %c0_i32_1, %c0_i32_2 : i32, i32, i32, i32
  }
  func.func @transform_2(%arg0: i32, %arg1: i32, %arg2: i32) -> (i32, i32) {
    %c0_i32 = arith.constant 0 : i32
    %c0_i32_0 = arith.constant 0 : i32
    %c0_i32_1 = arith.constant 0 : i32
    return %c0_i32, %c0_i32_0 : i32, i32
  }
  func.func @transform_3(%arg0: i32, %arg1: i32, %arg2: i32) -> (i32, i32, i32, i32, i32) {
    %c0_i32 = arith.constant 0 : i32
    %c0_i32_0 = arith.constant 0 : i32
    %c0_i32_1 = arith.constant 0 : i32
    return %arg0, %arg2, %arg1, %c0_i32, %c0_i32_0 : i32, i32, i32, i32, i32
  }
}

</mosaic_0001>

<bundles_post_ra>
// kernel: tpu_custom_call.1
= control target key start
LH: loop header
LB: loop body
LE: loop exit
PB: predicated region body
PF: predicated region fallthrough
CT: control target
= control target key end

     0   :  { %8 = vsyncpa [#allocation4], 0  ;;  %s3834_s0 = inlined_call_operand.vmem [shape: bf16[2,16,16,8], index: 0, kind: input, shape index: {}]   ;;  %s3835_s1 = inlined_call_operand.vmem [shape: bf16[2,2,24,16], index: 1, kind: input, shape index: {}]   ;;  %s3836_s2 = inlined_call_operand.vmem [shape: f32[1,16], index: 2, kind: input, shape index: {}]   ;;  %s3837_s3 = inlined_call_operand.hbm [shape: f32[2,2,16,16,16], index: 3, kind: output, shape index: {}]  }
   0x1   :  { %10 = vsyncpa [#allocation4 + $0x1], 0  ;;  %s2514_s12 = smov 0   ;;  %s2516_s13 = smov 0  }
   0x2   :  { %s2518_s14 = smov 0   ;;  %s2520_s15 = smov 0  }
   0x3   :  { %s2522_s16 = smov 0   ;;  %s2524_s17 = smov 0  }
   0x4   :  { %s2526_s18 = smov 0   ;;  %s2528_s19 = smov 0  }
   0x5 LB: > { %s2048_s20 = sadd.s32 4294967295, %s2487_s19   ;;  %s2049_s21 = sadd.s32 4294967294, %s2487_s19   ;;  %s2487_s19 = sphi %s2528_s19, %s16_s19   ;;  %s2483_s18 = sphi %s2526_s18, %s3981_s18   ;;  %s2479_s17 = sphi %s2524_s17, %s3980_s17   ;;  %s2475_s16 = sphi %s2522_s16, %s3979_s16   ;;  %s2471_s15 = sphi %s2520_s15, %s3978_s15   ;;  %s2467_s14 = sphi %s2518_s14, %s3977_s14   ;;  %s2463_s13 = sphi %s2516_s13, %s3976_s13   ;;  %s2459_s12 = sphi %s2514_s12, %s3975_s12  }
   0x6   : > { %s28_s22 = sadd.s32 1, %s2479_s17  ;;  %s35_s23 = sadd.s32 1, %s2483_s18 }
   0x7   : > { %p29_p0 = scmp.ge.s32.totalorder %s28_s22, 2  ;;  %p124_p1 = scmp.ne.s32.totalorder %s2467_s14, %s2463_s13 }
   0x8   : > { %p125_p2 = scmp.eq.s32.totalorder %s2048_s20, 3  ;;  %p130_p5 = scmp.ne.s32.totalorder %s2463_s13, %s2459_s12 }
   0x9   : > { %s3983_s22 = smov (%p29_p0, %s28_s22), 0  ;;  %s3985_s23 = smov (!%p29_p0, %s35_s23), %s2483_s18 }
   0xa   : > { %s108_s24 = ssub.s32 %s2479_s17, %s3983_s22  ;;  %p2565_p3 = por %p125_p2, %p124_p1 }
   0xb   : > { %p37_p4 = scmp.ge.s32.totalorder %s3985_s23, 2  ;;  %p131_p6 = scmp.eq.s32.totalorder %s2049_s21, 3 }
   0xc   : > { %p2052_p7 = scmp.ge.s32.totalorder %s2487_s19, 1  ;;  %p163_p9 = scmp.lt.s32.totalorder %s2487_s19, 5 }
   0xd   : > { %s3987_s23 = smov (%p37_p4, %s3985_s23), 0  ;;  %p2574_p8 = por %p131_p6, %p130_p5 }
   0xe   : > { %s107_s27 = ssub.s32 %s2483_s18, %s3987_s23  ;;  %s114_s28 = sadd.s32 1, %s2467_s14 }
   0xf   : > { %s109_s29 = sor.u32 %s108_s24, %s107_s27  ;;  %p164_p10 = pnand %p2052_p7, %p163_p9 }
  0x10   : > { %p112_p11 = scmp.eq.s32.totalorder %s109_s29, 0  ;;  %s184_s4 = sand.u32 (!%p164_p10), 1, %s2463_s13  }
  0x11   : > { %167 = sbr.rel (%p164_p10) target bundleno = 590 (0x24e), region = 32  ;;  %p187_p12 = scmp.lt.s32.totalorder (!%p164_p10), %s2475_s16, 1 }
  0x12   : > { %s2583_s30 = scalar_select %p112_p11, %s2467_s14, %s114_s28  }
  0x13   : > { %s2053_s5 = sshll.u32 (!%p164_p10), %s184_s4, 8  ;;  %p2056_p13 = scmp.ne.s32.totalorder (!%p164_p10), %s2471_s15, 0 }
  0x14   : > { %s2595_s11 = scalar_lea.vmem (!%p164_p10), [#allocation3], %s2053_s5 }
  0x16   : > { %s188_s6 = scalar_select %p187_p12, %s2475_s16, 1 }
  0x17   : > { %197 = sbr.rel (%p2056_p13) target bundleno = 313 (0x139), region = 36 }
  0x18   : > { %s2275_s7 = sshll.u32 %s188_s6, 7 }
  0x19   : > { %s2593_s10 = scalar_lea.vmem %s3834_s0, %s2275_s7 }
  0x1c   : > { %v2599_v0 = vld [vmem:[%s2593_s10 + $0x8] sm:$0xf]  ;;  %v2602_v1 = vld [vmem:[%s2593_s10] sm:$0xf]  ;;  %s2489_s20 = smov 8   ;;  %s2490_s21 = smov 16  }
  0x1d   : > { %270 = vrot.lane.b32.xlu1 %v2599_v0, %s2489_s20  ;;  %266 = vrot.lane.b32.xlu0 %v2602_v1, %s2489_s20  ;;  %v2609_v2 = vld [vmem:[%s2593_s10 + $0x10] sm:$0xf]  ;;  %v2614_v3 = vld [vmem:[%s2593_s10 + $0xc] sm:$0xf]  ;;  %v466_v20 = vshrl.u32 %v2599_v0, 16  ;;  %v3840_v21 = vshll.u32 %v2599_v0, 16 }
  0x1e   : > { %274 = vrot.lane.b32.xlu2 %v2609_v2, %s2489_s20  ;;  %v2617_v4 = vld [vmem:[%s2593_s10 + $0x4] sm:$0xf]  ;;  %v2624_v5 = vld [vmem:[%s2593_s10 + $0x14] sm:$0xf]  ;;  %v2629_v6 = vld [vmem:[%s2593_s10 + $0x1c] sm:$0xf] }
  0x1f   : > { %v2632_v7 = vld [vmem:[%s2593_s10 + $0x18] sm:$0xf]  ;;  %v2639_v8 = vld [vmem:[%s2593_s10 + $0x20] sm:$0xf]  ;;  %v2644_v9 = vld [vmem:[%s2593_s10 + $0x28] sm:$0xf] }
  0x20   : > { %3879 = vst [vmem:[#allocation6_spill] sm:$0xff] %v2632_v7  ;;  %v2647_v10 = vld [vmem:[%s2593_s10 + $0x24] sm:$0xf]  ;;  %v2654_v11 = vld [vmem:[%s2593_s10 + $0x2c] sm:$0xf]  ;;  %v3849_v22 = vshrl.u32 %v2609_v2, 16 }
  0x21   : > { %3880 = vst [vmem:[#allocation7_spill] sm:$0xff] %v2644_v9  ;;  %v2659_v12 = vld [vmem:[%s2593_s10 + $0x34] sm:$0xf]  ;;  %v2662_v13 = vld [vmem:[%s2593_s10 + $0x30] sm:$0xf]  ;;  %v3846_v23 = vshll.u32 %v2609_v2, 16 }
  0x22   : > { %3881 = vst [vmem:[#allocation8_spill] sm:$0xff] %v2662_v13  ;;  %v2669_v14 = vld [vmem:[%s2593_s10 + $0x38] sm:$0xf]  ;;  %v2674_v15 = vld [vmem:[%s2593_s10 + $0x40] sm:$0xf]  ;;  %v3850_v25 = vshll.u32 %v2614_v3, 16 }
  0x23   : > { %3882 = vst [vmem:[#allocation9_spill] sm:$0xff] %v2674_v15  ;;  %v2677_v16 = vld [vmem:[%s2593_s10 + $0x3c] sm:$0xf]  ;;  %v2684_v17 = vld [vmem:[%s2593_s10 + $0x44] sm:$0xf]  ;;  %v3847_v26 = vshll.u32 %v2624_v5, 16 }
  0x24   : > { %v2689_v18 = vld [vmem:[%s2593_s10 + $0x4c] sm:$0xf]  ;;  %v2692_v19 = vld [vmem:[%s2593_s10 + $0x48] sm:$0xf]  ;;  %v2703_v24 = vld [vmem:[%s2593_s10 + $0x50] sm:$0xf] }
  0x25   : > { %272 = vrot.lane.b32.xlu1 %v2614_v3, %s2489_s20  ;;  %268 = vrot.lane.b32.xlu0 %v2617_v4, %s2489_s20  ;;  %3883 = vst [vmem:[#allocation10_spill] sm:$0xff] %v2692_v19  ;;  %v868_v27 = vrot.slane %v466_v20, 4  ;;  %v869_v28 = vrot.slane %v3840_v21, 5  ;;  %v877_v29 = vrot.slane %v3849_v22, 4  ;;  %v878_v30 = vrot.slane %v3846_v23, 5 }
  0x26   : > { %276 = vrot.lane.b32.xlu2 %v2624_v5, %s2489_s20  ;;  %v2718_v31 = vld [vmem:[%s2593_s10 + $0x58] sm:$0xf]  ;;  %v2721_v32 = vld [vmem:[%s2593_s10 + $0x54] sm:$0xf]  ;;  %v2725_v33 = vrot.slane %v3850_v25, 5  ;;  %v2729_v34 = vrot.slane %v3847_v26, 5 }
  0x27   : > { %3884 = vst [vmem:[#allocation11_spill] sm:$0xff] %v2718_v31  ;;  %vm856_vm0 = vsmask.f32 3328  ;;  %vm857_vm1 = vsmask.f32 7440  ;;  %v870_v35 = vor.u32 %v869_v28, %v868_v27  ;;  %v879_v36 = vor.u32 %v878_v30, %v877_v29 }
  0x28   : > { %v2736_v37 = vld [vmem:[%s2593_s10 + $0x5c] sm:$0xf]  ;;  %vm2739_vm2 = vmor %vm856_vm0, %vm857_vm1  ;;  %v2758_v43 = vld [vmem:[%s2593_s10 + $0x64] sm:$0xf]  ;;  %v3845_v45 = vshrl.u32 %v2644_v9, 16  ;;  %v3838_v46 = vshll.u32 %v2644_v9, 16 }
  0x29   : > { %v2743_v39 = vrot.slane %v870_v35, 4  ;;  %v2745_v40 = vrot.slane %v879_v36, 4  ;;  %3887 = vst [vmem:[#allocation12_spill] sm:$0xff] %v2758_v43  ;;  %v2761_v44 = vld [vmem:[%s2593_s10 + $0x60] sm:$0xf]  ;;  %v3844_v47 = vshrl.u32 %v2639_v8, 16 }
  0x2a   : > { %3888 = vst [vmem:[#allocation13_spill] sm:$0xff] %v2761_v44  ;;  %v3841_v48 = vshll.u32 %v2639_v8, 16  ;;  %v2772_v49 = vld [vmem:[%s2593_s10 + $0x68] sm:$0xf]  ;;  %v450_v50 = vshrl.u32 %v2602_v1, 16  ;;  %v3839_v51 = vshll.u32 %v2602_v1, 16 }
  0x2b   : > { %v873_v41 = vsel %vm2739_vm2, %v2743_v39, %v2725_v33  ;;  %v904_v52 = vrot.slane %v3845_v45, 4  ;;  %v3843_v53 = vshll.u32 %v2647_v10, 16  ;;  %v905_v54 = vrot.slane %v3838_v46, 5  ;;  %v2789_v58 = vld [vmem:[%s2593_s10 + $0x70] sm:$0xf] }
  0x2c   : > { %v895_v55 = vrot.slane %v3844_v47, 4  ;;  %v896_v56 = vrot.slane %v3841_v48, 5  ;;  %v3842_v57 = vshll.u32 %v2654_v11, 16  ;;  %3889 = vst [vmem:[#allocation14_spill] sm:$0xff] %v2789_v58  ;;  %v2792_v59 = vld [vmem:[%s2593_s10 + $0x6c] sm:$0xf] }
  0x2d   : > { %280 = vrot.lane.b32.xlu1 %v2629_v6, %s2489_s20  ;;  %278 = vrot.lane.b32.xlu0 %v2632_v7, %s2489_s20  ;;  %v859_v60 = vrot.slane %v450_v50, 4  ;;  %v860_v61 = vrot.slane %v3839_v51, 5  ;;  %v458_v62 = vshrl.u32 %v2617_v4, 16  ;;  %v3848_v63 = vshll.u32 %v2617_v4, 16  ;;  %v2813_v35 = vld [vmem:[%s2593_s10 + $0x74] sm:$0xf] }
  0x2e   : > { %282 = vrot.lane.b32.xlu2 %v2639_v8, %s2489_s20  ;;  %v2802_v27 = vrot.slane %v3843_v53, 5  ;;  %v2806_v28 = vrot.slane %v3842_v57, 5  ;;  %v897_v29 = vor.u32 %v896_v56, %v895_v55  ;;  %v906_v30 = vor.u32 %v905_v54, %v904_v52  ;;  %3890 = vst [vmem:[#allocation15_spill] sm:$0xff] %v2813_v35  ;;  %v2833_v56 = vld [vmem:[%s2593_s10 + $0x78] sm:$0xf] }
  0x2f   : > { %v861_v51 = vor.u32 %v860_v61, %v859_v60  ;;  %v863_v21 = vrot.slane %v3848_v63, 5  ;;  %v865_v48 = vrot.slane %v458_v62, 4  ;;  %v474_v54 = vshrl.u32 %v2614_v3, 16  ;;  %v2836_v60 = vld [vmem:[%s2593_s10 + $0x7c] sm:$0xf] }
  0x30   : > { %v2815_v36 = vrot.slane %v897_v29, 4  ;;  %v2817_v46 = vrot.slane %v906_v30, 4  ;;  %v490_v30 = vshrl.u32 %v2624_v5, 16  ;;  %v498_v45 = vshrl.u32 %v2632_v7, 16 }
  0x31   : > { %v862_v61 = vrot.slane %v861_v51, 4  ;;  %v866_v57 = vor.u32 %v865_v48, %v863_v21  ;;  %v874_v52 = vrot.slane %v474_v54, 4  ;;  %v3852_v23 = vshrl.u32 %v2674_v15, 16 }
  0x32   : > { %v883_v53 = vrot.slane %v490_v30, 4  ;;  %v3853_v55 = vshll.u32 %v2674_v15, 16  ;;  %v3854_v26 = vshrl.u32 %v2669_v14, 16  ;;  %v506_v48 = vshrl.u32 %v2629_v6, 16 }
  0x33   : > { %v864_v29 = vsel %vm2739_vm2, %v862_v61, %v863_v21  ;;  %v867_v47 = vrot.slane %v866_v57, 4  ;;  %v875_v51 = vor.u32 %v874_v52, %v2725_v33  ;;  %v3851_v61 = vshll.u32 %v2632_v7, 16 }
  0x34   : > { %v3857_v21 = vshll.u32 %v2669_v14, 16  ;;  %v509_v57 = vshll.u32 %v2629_v6, 16  ;;  %v884_v52 = vor.u32 %v883_v53, %v2729_v34  ;;  %v2865_v63 = vrot.slane %v466_v20, 7 }
  0x35   : > { %286 = vrot.lane.b32.xlu1 %v2644_v9, %s2489_s20  ;;  %284 = vrot.lane.b32.xlu0 %v2647_v10, %s2489_s20  ;;  %v886_v22 = vrot.slane %v498_v45, 4  ;;  %v887_v6 = vrot.slane %v3851_v61, 5  ;;  %v932_v33 = vrot.slane %v3853_v55, 5  ;;  %v922_v39 = vrot.slane %v3854_v26, 4 }
  0x36   : > { %288 = vrot.lane.b32.xlu2 %v2654_v11, %s2489_s20  ;;  %v890_v53 = vrot.slane %v509_v57, 5  ;;  %v885_v42 = vrot.slane %v884_v52, 4  ;;  %vm363_vm3 = vcmask 126016   ;;  %v472_v61 = vrot.slane %v2865_v63, 4 }
  0x37   : > { %v476_v55 = vrot.slane %v474_v54, 7  ;;  %v460_v25 = vrot.slane %v458_v62, 7  ;;  %v508_v26 = vrot.slane %v506_v48, 7  ;;  %v538_v20 = vshrl.u32 %v2654_v11, 16 }
  0x38   : > { %v3892_v52 = vshll.u32 %v2684_v17, 16  ;;  %v522_v54 = vshrl.u32 %v2647_v10, 16  ;;  %v492_v62 = vrot.slane %v490_v30, 7  ;;  %vm396_vm4 = vcmask 57344  }
  0x39   : > { %vm397_vm5 = vsmask.f32 256  ;;  %v3894_v30 = vshll.u32 %v2614_v3, 16  ;;  %vm447_vm7 = vsmask.f32 4368  ;;  %vm737_vm9 = vcmask 60416  }
  0x3a   : > { %vm2932_vm6 = vmand %vm396_vm4, %vm397_vm5  ;;  %vm738_vm10 = vsmask.f32 7938  ;;  %vm805_vm12 = vcmask 191619   ;;  %vm806_vm13 = vsmask.f32 7950  ;;  %vm1099_vm15 = vcmask 191616  }
  0x3b   : > { %vm2946_vm8 = vmor %vm397_vm5, %vm447_vm7 }
  0x3c   : > { %vm2993_vm11 = vmand %vm737_vm9, %vm738_vm10 }
  0x3d   : > { %292 = vrot.lane.b32.xlu1 %v2659_v12, %s2489_s20  ;;  %290 = vrot.lane.b32.xlu0 %v2662_v13, %s2489_s20  ;;  %vm3023_vm14 = vmand %vm805_vm12, %vm806_vm13 }
  0x3e   : > { %294 = vrot.lane.b32.xlu2 %v2669_v14, %s2489_s20  ;;  %vm3547_vm1 = vmand %vm1099_vm15, %vm856_vm0  ;;  %vm1170_vm0 = vcmask 191488  }
  0x45   : > { %298 = vrot.lane.b32.xlu1 %v2674_v15, %s2489_s20  ;;  %296 = vrot.lane.b32.xlu0 %v2677_v16, %s2489_s20 }
  0x46   : > { %300 = vrot.lane.b32.xlu2 %v2684_v17, %s2489_s20 }
  0x4d   : > { %304 = vrot.lane.b32.xlu1 %v2689_v18, %s2489_s20  ;;  %302 = vrot.lane.b32.xlu0 %v2692_v19, %s2489_s20 }
  0x4e   : > { %306 = vrot.lane.b32.xlu2 %v2703_v24, %s2489_s20 }
  0x55   : > { %310 = vrot.lane.b32.xlu1 %v2718_v31, %s2489_s20  ;;  %308 = vrot.lane.b32.xlu0 %v2721_v32, %s2489_s20  ;;  %v2892_v31 = vrot.slane %v3892_v52, 5 }
  0x56   : > { %312 = vrot.lane.b32.xlu2 %v2736_v37, %s2489_s20 }
  0x5d   : > { %316 = vrot.lane.b32.xlu1 %v2758_v43, %s2489_s20  ;;  %314 = vrot.lane.b32.xlu0 %v2761_v44, %s2489_s20 }
  0x5e   : > { %318 = vrot.lane.b32.xlu2 %v2772_v49, %s2489_s20 }
  0x65   : > { %322 = vrot.lane.b32.xlu1 %v2789_v58, %s2489_s20  ;;  %320 = vrot.lane.b32.xlu0 %v2792_v59, %s2489_s20  ;;  %v3891_v58 = vshll.u32 %v2677_v16, 16 }
  0x66   : > { %324 = vrot.lane.b32.xlu2 %v2813_v35, %s2489_s20 }
  0x6d   : > { %326 = vrot.lane.b32.xlu0 %v2833_v56, %s2489_s20  ;;  %328 = vrot.lane.b32.xlu1 %v2836_v60, %s2489_s20 }
  0x6e   : > { %1003 = vrot.lane.b32.xlu2 %v864_v29, %s2490_s21  ;;  %v876_v29 = vrot.slane %v875_v51, 4  ;;  %v892_v51 = vrot.slane %v506_v48, 4 }
  0x70   : > { %v893_v48 = vor.u32 %v892_v51, %v890_v53  ;;  %v3897_v51 = vshll.u32 %v2624_v5, 16 }
  0x75   : > { %1005 = vrot.lane.b32.xlu0 %v867_v47, %s2490_s21  ;;  %1007 = vrot.lane.b32.xlu1 %v873_v41, %s2490_s21  ;;  %v931_v47 = vrot.slane %v3852_v23, 4  ;;  %v923_v41 = vrot.slane %v3857_v21, 5  ;;  %v2883_v23 = vrot.slane %v450_v50, 7  ;;  %v2887_v21 = vrot.slane %v3891_v58, 5 }
  0x76   : > { %1009 = vrot.lane.b32.xlu2 %v876_v29, %s2490_s21  ;;  %v888_v50 = vor.u32 %v887_v6, %v886_v22  ;;  %v3893_v58 = vsel %vm2739_vm2, %v2745_v40, %v2729_v34  ;;  %v3895_v34 = vshrl.u32 %v2609_v2, 16 }
  0x77   : > { %v924_v29 = vor.u32 %v923_v41, %v922_v39  ;;  %v933_v35 = vor.u32 %v932_v33, %v931_v47  ;;  %v456_v6 = vrot.slane %v2883_v23, 4  ;;  %v479_v47 = vor.u32 %v3894_v30, %v476_v55 }
  0x78   : > { %v275_v7 = vpop.permute.xlu2 %274  ;;  %v889_v22 = vrot.slane %v888_v50, 4  ;;  %v2910_v33 = vrot.slane %v498_v45, 7  ;;  %v484_v40 = vrot.slane %v3895_v34, 7  ;;  %v3896_v45 = vshll.u32 %v2617_v4, 16 }
  0x79   : > { %368 = vst.msk [vmem:[#allocation2 + $0x18] sm:$0xf] %vm363_vm3, %v275_v7  ;;  %v2903_v52 = vrot.slane %v924_v29, 4  ;;  %v2905_v7 = vrot.slane %v933_v35, 4  ;;  %v495_v29 = vor.u32 %v3897_v51, %v492_v62  ;;  %v894_v50 = vrot.slane %v893_v48, 4 }
  0x7a   : > { %v891_v3 = vsel %vm2739_vm2, %v889_v22, %v890_v53  ;;  %v463_v55 = vor.u32 %v3896_v45, %v460_v25  ;;  %v488_v41 = vrot.slane %v484_v40, 4  ;;  %v511_v30 = vor.u32 %v509_v57, %v508_v26 }
  0x7b   : > { %v504_v34 = vrot.slane %v2910_v33, 4  ;;  %v901_v53 = vrot.slane %v522_v54, 4  ;;  %v554_v4 = vshrl.u32 %v2659_v12, 16  ;;  %v557_v25 = vshll.u32 %v2659_v12, 16 }
  0x7c   : > { %v546_v62 = vshrl.u32 %v2662_v13, 16  ;;  %v3863_v48 = vshll.u32 %v2662_v13, 16  ;;  %v3902_v12 = vsel %vm2739_vm2, %v2815_v36, %v2802_v27  ;;  %v496_v57 = vsel %vm2946_vm8, %v488_v41, %v495_v29 }
  0x7d   : > { %1011 = vrot.lane.b32.xlu0 %v3893_v58, %s2490_s21  ;;  %1013 = vrot.lane.b32.xlu1 %v885_v42, %s2490_s21  ;;  %v910_v42 = vrot.slane %v538_v20, 4  ;;  %v2966_v51 = vsel %vm2946_vm8, %v456_v6, %v463_v55  ;;  %v2973_v36 = vsel %vm2946_vm8, %v504_v34, %v511_v30  ;;  %v3904_v41 = vshrl.u32 %v2644_v9, 16 }
  0x7e   : > { %1015 = vrot.lane.b32.xlu2 %v891_v3, %s2490_s21  ;;  %v917_v6 = vrot.slane %v557_v25, 5  ;;  %v919_v55 = vrot.slane %v554_v4, 4  ;;  %v3906_v30 = vshrl.u32 %v2639_v8, 16  ;;  %v602_v39 = vshrl.u32 %v2689_v18, 16 }
  0x7f   : > { %v911_v3 = vor.u32 %v910_v42, %v2806_v28  ;;  %v2962_v42 = vsel %vm2946_vm8, %v472_v61, %v479_v47  ;;  %v2978_v29 = vrot.slane %v3904_v41, 7  ;;  %v524_v61 = vrot.slane %v522_v54, 7 }
  0x80   : > { %v405_v22 = vld [vmem:[#allocation2 + $0x18] sm:$0x1]  ;;  %v277_v5 = vpop.permute.xlu2 %276  ;;  %v556_v47 = vrot.slane %v554_v4, 7  ;;  %v2986_v34 = vrot.slane %v3906_v30, 7  ;;  %v3910_v41 = vshll.u32 %v2647_v10, 16 }
  0x81   : > { %v406_v45 = vsel %vm2932_vm6, 0, %v405_v22  ;;  %369 = vst.msk [vmem:[#allocation2 + $0x1c] sm:$0xf] %vm363_vm3, %v277_v5  ;;  %v902_v5 = vor.u32 %v901_v53, %v2802_v27  ;;  %v912_v27 = vrot.slane %v911_v3, 4  ;;  %v3907_v53 = vshrl.u32 %v2674_v15, 16 }
  0x82   : > { %407 = vst [vmem:[#allocation2 + $0x18] sm:$0x1] %v406_v45  ;;  %v2980_v45 = vrot.slane %v546_v62, 7  ;;  %v570_v3 = vshrl.u32 %v2677_v16, 16  ;;  %v3004_v30 = vor.u32 %v3910_v41, %v524_v61 }
  0x83   : > { %752 = vst.msk [vmem:[#allocation2 + $0x1c] sm:$0xf] %vm737_vm9, %v496_v57  ;;  %v2990_v57 = vrot.slane %v3907_v53, 7  ;;  %v3006_v53 = vor.u32 %v557_v25, %v556_v47  ;;  %v920_v25 = vor.u32 %v919_v55, %v917_v6 }
  0x84   : > { %3905 = vst [vmem:[#allocation16_spill] sm:$0xff] %v2978_v29  ;;  %v3027_v41 = vrot.slane %v570_v3, 7  ;;  %v928_v55 = vrot.slane %v570_v3, 4  ;;  %v3867_v3 = vshll.u32 %v2758_v43, 16 }
  0x85   : > { %1017 = vrot.lane.b32.xlu0 %v894_v50, %s2490_s21  ;;  %1019 = vrot.lane.b32.xlu1 %v3902_v12, %s2490_s21  ;;  %v3903_v50 = vshll.u32 %v2609_v2, 16  ;;  %v903_v2 = vrot.slane %v902_v5, 4  ;;  %v914_v12 = vrot.slane %v3863_v48, 5  ;;  %v921_v35 = vrot.slane %v920_v25, 4 }
  0x86   : > { %v3915_v25 = vshll.u32 %v2692_v19, 16 }
  0x87   : > { %v487_v22 = vor.u32 %v3903_v50, %v484_v40  ;;  %v913_v40 = vrot.slane %v546_v62, 4  ;;  %1021 = vrot.lane.b32.xlu2 %v903_v2, %s2490_s21  ;;  %v586_v62 = vshrl.u32 %v2684_v17, 16  ;;  %v3911_v50 = vsel %vm2739_vm2, %v2817_v46, %v2806_v28 }
  0x88   : > { %v283_v5 = vpop.permute.xlu2 %282  ;;  %v540_v46 = vrot.slane %v538_v20, 7  ;;  %v3864_v28 = vshll.u32 %v2689_v18, 16  ;;  %v3052_v20 = vrot.slane %v602_v39, 4 }
  0x89   : > { %v749_v2 = vld [vmem:[#allocation2 + $0x18] sm:$0xf]  ;;  %372 = vst.msk [vmem:[#allocation2 + $0x28] sm:$0xf] %vm363_vm3, %v283_v5  ;;  %v915_v5 = vor.u32 %v914_v12, %v913_v40  ;;  %v3036_v12 = vrot.slane %v602_v39, 7 }
  0x8a   : > { %v750_v10 = vsel %vm2993_vm11, %v487_v22, %v749_v2  ;;  %v814_v47 = vld [vmem:[#allocation2 + $0x1c] sm:$0x8]  ;;  %v3050_v4 = vrot.slane %v3864_v28, 5  ;;  %v3917_v28 = vshll.u32 %v2721_v32, 16 }
  0x8b   : > { %751 = vst [vmem:[#allocation2 + $0x18] sm:$0xf] %v750_v10  ;;  %v815_v22 = vsel %vm3023_vm14, 0, %v814_v47  ;;  %v916_v40 = vrot.slane %v915_v5, 4  ;;  %v937_v47 = vrot.slane %v586_v62, 4  ;;  %v3914_v5 = vshll.u32 %v2654_v11, 16 }
  0x8c   : > { %816 = vst [vmem:[#allocation2 + $0x1c] sm:$0x8] %v815_v22  ;;  %v3080_v11 = vrot.slane %v586_v62, 7 }
  0x8d   : > { %1023 = vrot.lane.b32.xlu0 %v3911_v50, %s2490_s21  ;;  %1025 = vrot.lane.b32.xlu1 %v912_v27, %s2490_s21  ;;  %v594_v27 = vshrl.u32 %v2692_v19, 16  ;;  %v918_v22 = vsel %vm2739_vm2, %v916_v40, %v917_v6  ;;  %v543_v50 = vor.u32 %v3914_v5, %v540_v46  ;;  %v3062_v6 = vrot.slane %v3915_v25, 5 }
  0x8e   : > { %v3916_v5 = vshrl.u32 %v2669_v14, 16  ;;  %v3084_v19 = vrot.slane %v3867_v3, 5  ;;  %v938_v62 = vor.u32 %v937_v47, %v2892_v31  ;;  %v929_v3 = vor.u32 %v928_v55, %v2887_v21 }
  0x8f   : > { %v271_v2 = vpop.permute.xlu1 %270  ;;  %v267_v48 = vpop.permute.xlu0 %266  ;;  %1027 = vrot.lane.b32.xlu2 %v918_v22, %s2490_s21  ;;  %v3056_v10 = vrot.slane %v594_v27, 7  ;;  %v3918_v22 = vshrl.u32 %v2721_v32, 16  ;;  %v3923_v47 = vrot.slane %v2978_v29, 4  ;;  %v3932_v29 = vshrl.u32 %v2792_v59, 16 }
  0x90   : > { %366 = vst.msk [vmem:[#allocation2 + $0x10] sm:$0xf] %vm363_vm3, %v271_v2  ;;  %v411_v46 = vld [vmem:[#allocation2 + $0x28] sm:$0x1]  ;;  %v289_v40 = vpop.permute.xlu2 %288  ;;  %v3067_v39 = vrot.slane %v3916_v5, 7  ;;  %v3071_v2 = vrot.slane %v3917_v28, 5  ;;  %v3920_v28 = vsel %vm2739_vm2, %v2903_v52, %v2887_v21 }
  0x91   : > { %364 = vst.msk [vmem:[#allocation2 + $0x8] sm:$0xf] %vm363_vm3, %v267_v48  ;;  %v3058_v48 = vrot.slane %v594_v27, 4  ;;  %v3075_v27 = vrot.slane %v3918_v22, 4  ;;  %v412_v25 = vsel %vm2932_vm6, 0, %v411_v46  ;;  %v3919_v5 = vshrl.u32 %v2758_v43, 16 }
  0x92   : > { %375 = vst.msk [vmem:[#allocation2 + $0x34] sm:$0xf] %vm363_vm3, %v289_v40  ;;  %v3921_v46 = vshrl.u32 %v2761_v44, 16  ;;  %v3875_v43 = vshll.u32 %v2833_v56, 16 }
  0x93   : > { %v3088_v15 = vrot.slane %v3919_v5, 4  ;;  %413 = vst [vmem:[#allocation2 + $0x28] sm:$0x1] %v412_v25  ;;  %v3924_v5 = vshll.u32 %v2639_v8, 16  ;;  %v1111_v58 = vld [vmem:[#allocation2 + $0x1c] sm:$0xf] }
  0x94   : > { %v967_v40 = vrot.slane %v3921_v46, 4  ;;  %v544_v46 = vsel %vm2946_vm8, %v3923_v47, %v543_v50  ;;  %v930_v50 = vrot.slane %v929_v3, 4  ;;  %v3925_v47 = vshrl.u32 %v2703_v24, 16 }
  0x95   : > { %1029 = vrot.lane.b32.xlu0 %v921_v35, %s2490_s21  ;;  %1031 = vrot.lane.b32.xlu1 %v3920_v28, %s2490_s21  ;;  %v3922_v35 = vshll.u32 %v2761_v44, 16  ;;  %v519_v22 = vor.u32 %v3924_v5, %v2986_v34  ;;  %v939_v44 = vrot.slane %v938_v62, 4  ;;  %v3926_v5 = vshll.u32 %v2703_v24, 16  ;;  %764 = vst.msk [vmem:[#allocation2 + $0x34] sm:$0xf] %vm737_vm9, %v544_v46 }
  0x96   : > { %v949_v8 = vrot.slane %v3925_v47, 4  ;;  %v947_v62 = vor.u32 %v3052_v20, %v3050_v4  ;;  %v3927_v3 = vrot.slane %v2986_v34, 4  ;;  %v3930_v34 = vshll.u32 %v2602_v1, 16 }
  0x97   : > { %v968_v13 = vrot.slane %v3922_v35, 5  ;;  %v402_v28 = vld [vmem:[#allocation2 + $0x10] sm:$0x1]  ;;  %v273_v25 = vpop.permute.xlu1 %272  ;;  %v269_v9 = vpop.permute.xlu0 %268  ;;  %v950_v21 = vrot.slane %v3926_v5, 5  ;;  %1033 = vrot.lane.b32.xlu2 %v930_v50, %s2490_s21  ;;  %v3931_v5 = vshll.u32 %v2792_v59, 16  ;;  %v3933_v50 = vshrl.u32 %v2833_v56, 16 }
  0x98   : > { %v403_v55 = vsel %vm2932_vm6, 0, %v402_v28  ;;  %v399_v35 = vld [vmem:[#allocation2 + $0x8] sm:$0x1]  ;;  %367 = vst.msk [vmem:[#allocation2 + $0x14] sm:$0xf] %vm363_vm3, %v273_v25  ;;  %v658_v25 = vshrl.u32 %v2772_v49, 16  ;;  %v3934_v1 = vsel %vm2739_vm2, %v2905_v7, %v2892_v31 }
  0x99   : > { %404 = vst [vmem:[#allocation2 + $0x10] sm:$0x1] %v403_v55  ;;  %v400_v52 = vsel %vm2932_vm6, 0, %v399_v35  ;;  %v3137_v55 = vsel %vm2946_vm8, %v3927_v3, %v3004_v30  ;;  %v3139_v35 = vpop.permute.xlu2 %294  ;;  %v455_v30 = vor.u32 %v3930_v34, %v2883_v23  ;;  %v3157_v3 = vrot.slane %v3931_v5, 5 }
  0x9a   : > { %401 = vst [vmem:[#allocation2 + $0x8] sm:$0x1] %v400_v52  ;;  %v3928_v52 = vrot.slane %v2980_v45, 4  ;;  %v3161_v28 = vrot.slane %v3932_v29, 4  ;;  %v956_v23 = vor.u32 %v3075_v27, %v3071_v2  ;;  %v951_v29 = vor.u32 %v950_v21, %v949_v8 }
  0x9b   : > { %748 = vst.msk [vmem:[#allocation2 + $0x14] sm:$0xf] %vm737_vm9, %v2962_v42  ;;  %v3929_v42 = vshll.u32 %v2599_v0, 16  ;;  %v3170_v0 = vrot.slane %v3875_v43, 5  ;;  %v976_v31 = vrot.slane %v658_v25, 4  ;;  %v698_v7 = vshrl.u32 %v2836_v60, 16 }
  0x9c   : > { %v3146_v47 = vsel %vm2946_vm8, %v3928_v52, %v3006_v53  ;;  %365 = vst.msk [vmem:[#allocation2 + $0xc] sm:$0xf] %vm363_vm3, %v269_v9  ;;  %v757_v53 = vld [vmem:[#allocation2 + $0x28] sm:$0xf]  ;;  %v3166_v52 = vrot.slane %v3933_v50, 4  ;;  %v948_v5 = vrot.slane %v947_v62, 4 }
  0x9d   : > { %v471_v20 = vor.u32 %v3929_v42, %v2865_v63  ;;  %744 = vst.msk [vmem:[#allocation2 + $0xc] sm:$0xf] %vm737_vm9, %v2966_v51  ;;  %1035 = vrot.lane.b32.xlu0 %v3934_v1, %s2490_s21  ;;  %v758_v9 = vsel %vm2993_vm11, %v519_v22, %v757_v53  ;;  %1037 = vrot.lane.b32.xlu1 %v939_v44, %s2490_s21  ;;  %v3876_v63 = vshll.u32 %v2772_v49, 16  ;;  %v701_v22 = vshll.u32 %v2836_v60, 16 }
  0x9e   : > { %759 = vst [vmem:[#allocation2 + $0x28] sm:$0xf] %v758_v9  ;;  %v969_v51 = vor.u32 %v968_v13, %v967_v40  ;;  %v942_v42 = vor.u32 %v3062_v6, %v3058_v48  ;;  %v3194_v21 = vrot.slane %v951_v29, 4  ;;  %v3935_v48 = vshll.u32 %v2684_v17, 16 }
  0x9f   : > { %v281_v34 = vpop.permute.xlu1 %280  ;;  %v279_v44 = vpop.permute.xlu0 %278  ;;  %v957_v62 = vrot.slane %v956_v23, 4  ;;  %v977_v53 = vrot.slane %v3876_v63, 5  ;;  %v3937_v9 = vshrl.u32 %v2736_v37, 16  ;;  %378 = vst.msk [vmem:[#allocation2 + $0x40] sm:$0xf] %vm363_vm3, %v3139_v35 }
  0xa0   : > { %v745_v27 = vld [vmem:[#allocation2 + $0x10] sm:$0xf]  ;;  %371 = vst.msk [vmem:[#allocation2 + $0x24] sm:$0xf] %vm363_vm3, %v281_v34  ;;  %v3196_v13 = vrot.slane %v969_v51, 4  ;;  %v591_v6 = vor.u32 %v3935_v48, %v3080_v11  ;;  %v943_v46 = vrot.slane %v942_v42, 4  ;;  %v954_v17 = vsel %vm2739_vm2, %v3194_v21, %v3071_v2 }
  0xa1   : > { %v746_v40 = vsel %vm2993_vm11, %v471_v20, %v745_v27  ;;  %v740_v8 = vld [vmem:[#allocation2 + $0x8] sm:$0xf]  ;;  %756 = vst.msk [vmem:[#allocation2 + $0x24] sm:$0xf] %vm737_vm9, %v2973_v36  ;;  %v3936_v11 = vshll.u32 %v2736_v37, 16  ;;  %v964_v23 = vrot.slane %v3937_v9, 4  ;;  %v301_v29 = vpop.permute.xlu2 %300 }
  0xa2   : > { %747 = vst [vmem:[#allocation2 + $0x10] sm:$0xf] %v746_v40  ;;  %v741_v50 = vsel %vm2993_vm11, %v455_v30, %v740_v8  ;;  %v811_v1 = vld [vmem:[#allocation2 + $0x14] sm:$0x8]  ;;  %v972_v36 = vsel %vm2739_vm2, %v3196_v13, %v3084_v19  ;;  %v945_v51 = vsel %vm2739_vm2, %v943_v46, %v3050_v4  ;;  %v600_v42 = vrot.slane %v3056_v10, 4 }
  0xa3   : > { %v3219_v20 = vrot.slane %v3936_v11, 5  ;;  %742 = vst [vmem:[#allocation2 + $0x8] sm:$0xf] %v741_v50  ;;  %v812_v30 = vsel %vm3023_vm14, 0, %v811_v1  ;;  %v568_v34 = vrot.slane %v3067_v39, 4  ;;  %1039 = vrot.lane.b32.xlu2 %v945_v51, %s2490_s21  ;;  %v3233_v48 = vrot.slane %v701_v22, 5 }
  0xa4   : > { %813 = vst [vmem:[#allocation2 + $0x14] sm:$0x8] %v812_v30  ;;  %v808_v27 = vld [vmem:[#allocation2 + $0xc] sm:$0x8]  ;;  %v974_v4 = vor.u32 %v3088_v15, %v3084_v19  ;;  %v983_v8 = vor.u32 %v3161_v28, %v3157_v3  ;;  %v1000_v46 = vrot.slane %v698_v7, 4  ;;  %v3938_v1 = vrot.slane %v2990_v57, 4 }
  0xa5   : > { %v809_v40 = vsel %vm3023_vm14, 0, %v808_v27  ;;  %370 = vst.msk [vmem:[#allocation2 + $0x20] sm:$0xf] %vm363_vm3, %v279_v44  ;;  %1041 = vrot.lane.b32.xlu0 %v948_v5, %s2490_s21  ;;  %1045 = vrot.lane.b32.xlu1 %v957_v62, %s2490_s21  ;;  %v823_v50 = vld [vmem:[#allocation2 + $0x34] sm:$0x8]  ;;  %v978_v11 = vor.u32 %v977_v53, %v976_v31  ;;  %v996_v5 = vor.u32 %v3170_v0, %v3166_v52  ;;  %v3939_v62 = vld [vmem:[#allocation15_spill] sm:$0xff] }
  0xa6   : > { %810 = vst [vmem:[#allocation2 + $0xc] sm:$0x8] %v809_v40  ;;  %v592_v44 = vsel %vm2946_vm8, %v3938_v1, %v591_v6  ;;  %v682_v9 = vshrl.u32 %v3939_v62, 16  ;;  %v685_v15 = vshll.u32 %v3939_v62, 16  ;;  %v824_v28 = vsel %vm3023_vm14, 0, %v823_v50 }
  0xa7   : > { %v287_v30 = vpop.permute.xlu1 %286  ;;  %v285_v51 = vpop.permute.xlu0 %284  ;;  %v965_v27 = vor.u32 %v964_v23, %v3219_v20  ;;  %v3940_v31 = vshll.u32 %v2677_v16, 16  ;;  %v3941_v52 = vshll.u32 %v2689_v18, 16  ;;  %825 = vst [vmem:[#allocation2 + $0x34] sm:$0x8] %v824_v28  ;;  %v3265_v40 = vrot.slane %v978_v11, 4  ;;  %v3942_v28 = vld [vmem:[#allocation11_spill] sm:$0xff] }
  0xa8   : > { %v817_v53 = vld [vmem:[#allocation2 + $0x24] sm:$0x8]  ;;  %v3267_v50 = vrot.slane %v996_v5, 4  ;;  %374 = vst.msk [vmem:[#allocation2 + $0x30] sm:$0xf] %vm363_vm3, %v287_v30  ;;  %v975_v35 = vrot.slane %v974_v4, 4 }
  0xa9   : > { %v575_v6 = vor.u32 %v3940_v31, %v3027_v41  ;;  %v607_v0 = vor.u32 %v3941_v52, %v3036_v12  ;;  %v818_v1 = vsel %vm3023_vm14, 0, %v817_v53  ;;  %v984_v23 = vrot.slane %v983_v8, 4  ;;  %373 = vst.msk [vmem:[#allocation2 + $0x2c] sm:$0xf] %vm363_vm3, %v285_v51  ;;  %v307_v4 = vpop.permute.xlu2 %306 }
  0xaa   : > { %v966_v43 = vrot.slane %v965_v27, 4  ;;  %819 = vst [vmem:[#allocation2 + $0x24] sm:$0x8] %v818_v1  ;;  %v981_v16 = vsel %vm2739_vm2, %v3265_v40, %v3157_v3  ;;  %v999_v18 = vsel %vm2739_vm2, %v3267_v50, %v3233_v48  ;;  %v3282_v41 = vrot.slane %v685_v15, 5  ;;  %v3960_v40 = vld [vmem:[#allocation8_spill] sm:$0xff] }
  0xab   : > { %v991_v12 = vrot.slane %v682_v9, 4  ;;  %760 = vst.msk [vmem:[#allocation2 + $0x2c] sm:$0xf] %vm737_vm9, %v3137_v55  ;;  %v3291_v11 = vsel %vm2946_vm8, %v568_v34, %v575_v6  ;;  %v3295_v5 = vsel %vm2946_vm8, %v600_v42, %v607_v0  ;;  %v626_v30 = vshrl.u32 %v3942_v28, 16 }
  0xac   : > { %v408_v8 = vld [vmem:[#allocation2 + $0x20] sm:$0x1]  ;;  %1049 = vrot.lane.b32.xlu2 %v966_v43, %s2490_s21  ;;  %v1001_v55 = vor.u32 %v1000_v46, %v3233_v48  ;;  %381 = vst.msk [vmem:[#allocation2 + $0x4c] sm:$0xf] %vm363_vm3, %v301_v29  ;;  %v629_v34 = vshll.u32 %v3942_v28, 16  ;;  %v3943_v42 = vshrl.u32 %v2736_v37, 16 }
  0xad   : > { %v409_v51 = vsel %vm2932_vm6, 0, %v408_v8  ;;  %1053 = vrot.lane.b32.xlu0 %v975_v35, %s2490_s21  ;;  %1057 = vrot.lane.b32.xlu1 %v984_v23, %s2490_s21  ;;  %v420_v43 = vld [vmem:[#allocation2 + $0x40] sm:$0x1]  ;;  %776 = vst.msk [vmem:[#allocation2 + $0x4c] sm:$0xf] %vm737_vm9, %v592_v44  ;;  %v992_v0 = vor.u32 %v991_v12, %v3282_v41  ;;  %v3312_v53 = vrot.slane %v626_v30, 7 }
  0xae   : > { %v636_v27 = vrot.slane %v3943_v42, 7  ;;  %410 = vst [vmem:[#allocation2 + $0x20] sm:$0x1] %v409_v51  ;;  %v421_v31 = vsel %vm2932_vm6, 0, %v420_v43  ;;  %v3944_v29 = vld [vmem:[#allocation6_spill] sm:$0xff]  ;;  %v1002_v8 = vrot.slane %v1001_v55, 4 }
  0xaf   : > { %v293_v6 = vpop.permute.xlu1 %292  ;;  %v291_v52 = vpop.permute.xlu0 %290  ;;  %v414_v46 = vld [vmem:[#allocation2 + $0x30] sm:$0x1]  ;;  %422 = vst [vmem:[#allocation2 + $0x40] sm:$0x1] %v421_v31  ;;  %v3945_v1 = vshll.u32 %v3944_v29, 16  ;;  %v993_v51 = vrot.slane %v992_v0, 4 }
  0xb0   : > { %v415_v23 = vsel %vm2932_vm6, 0, %v414_v46  ;;  %377 = vst.msk [vmem:[#allocation2 + $0x3c] sm:$0xf] %vm363_vm3, %v293_v6  ;;  %v632_v42 = vrot.slane %v3312_v53, 4  ;;  %v958_v44 = vrot.slane %v626_v30, 4  ;;  %v959_v12 = vrot.slane %v629_v34, 5 }
  0xb1   : > { %v503_v35 = vor.u32 %v3945_v1, %v2910_v33  ;;  %v3946_v43 = vshll.u32 %v2736_v37, 16  ;;  %416 = vst [vmem:[#allocation2 + $0x30] sm:$0x1] %v415_v23  ;;  %v3327_v33 = vpop.permute.xlu2 %312  ;;  %v3947_v55 = vshll.u32 %v2669_v14, 16  ;;  %v3948_v0 = vshrl.u32 %v2721_v32, 16  ;;  %v3949_v37 = vld [vmem:[#allocation16_spill] sm:$0xff] }
  0xb2   : > { %v820_v63 = vld [vmem:[#allocation2 + $0x2c] sm:$0x8]  ;;  %768 = vst.msk [vmem:[#allocation2 + $0x3c] sm:$0xf] %vm737_vm9, %v3146_v47  ;;  %v3952_v1 = vld [vmem:[#allocation14_spill] sm:$0xff] }
  0xb3   : > { %v639_v31 = vor.u32 %v3946_v43, %v636_v27  ;;  %v567_v6 = vor.u32 %v3947_v55, %v3067_v39  ;;  %v620_v30 = vrot.slane %v3948_v0, 7  ;;  %v821_v46 = vsel %vm3023_vm14, 0, %v820_v63  ;;  %376 = vst.msk [vmem:[#allocation2 + $0x38] sm:$0xf] %vm363_vm3, %v291_v52  ;;  %v3950_v27 = vld [vmem:[#allocation7_spill] sm:$0xff] }
  0xb4   : > { %1061 = vrot.lane.b32.xlu2 %v993_v51, %s2490_s21  ;;  %v3951_v29 = vshll.u32 %v3950_v27, 16  ;;  %v674_v23 = vshrl.u32 %v3952_v1, 16  ;;  %v677_v43 = vshll.u32 %v3952_v1, 16  ;;  %822 = vst [vmem:[#allocation2 + $0x2c] sm:$0x8] %v821_v46  ;;  %v3953_v39 = vshrl.u32 %v2703_v24, 16 }
  0xb5   : > { %v753_v14 = vld [vmem:[#allocation2 + $0x20] sm:$0xf]  ;;  %1065 = vrot.lane.b32.xlu0 %v1002_v8, %s2490_s21  ;;  %1043 = vrot.lane.b32.xlu1 %v954_v17, %s2490_s21  ;;  %v832_v51 = vld [vmem:[#allocation2 + $0x4c] sm:$0x8]  ;;  %384 = vst.msk [vmem:[#allocation2 + $0x58] sm:$0xf] %vm363_vm3, %v307_v4  ;;  %v3357_v55 = vsel %vm2946_vm8, %v632_v42, %v639_v31  ;;  %v960_v8 = vor.u32 %v959_v12, %v958_v44 }
  0xb6   : > { %v535_v47 = vor.u32 %v3951_v29, %v3949_v37  ;;  %v612_v63 = vrot.slane %v3953_v39, 7  ;;  %v754_v52 = vsel %vm2993_vm11, %v503_v35, %v753_v14  ;;  %v769_v0 = vld [vmem:[#allocation2 + $0x40] sm:$0xf]  ;;  %v833_v2 = vsel %vm3023_vm14, 0, %v832_v51  ;;  %387 = vst.msk [vmem:[#allocation2 + $0x64] sm:$0xf] %vm363_vm3, %v3327_v33 }
  0xb7   : > { %755 = vst [vmem:[#allocation2 + $0x20] sm:$0xf] %v754_v52  ;;  %v299_v21 = vpop.permute.xlu1 %298  ;;  %v297_v17 = vpop.permute.xlu0 %296  ;;  %v3954_v46 = vshll.u32 %v2721_v32, 16  ;;  %v770_v35 = vsel %vm2993_vm11, %v567_v6, %v769_v0  ;;  %v961_v4 = vrot.slane %v960_v8, 4  ;;  %v985_v42 = vrot.slane %v674_v23, 4  ;;  %v3955_v6 = vld [vmem:[#allocation12_spill] sm:$0xff] }
  0xb8   : > { %v616_v27 = vrot.slane %v612_v63, 4  ;;  %834 = vst [vmem:[#allocation2 + $0x4c] sm:$0x8] %v833_v2  ;;  %v761_v29 = vld [vmem:[#allocation2 + $0x30] sm:$0xf]  ;;  %v986_v44 = vrot.slane %v677_v43, 5 }
  0xb9   : > { %v623_v37 = vor.u32 %v3954_v46, %v620_v30  ;;  %771 = vst [vmem:[#allocation2 + $0x40] sm:$0xf] %v770_v35  ;;  %v762_v12 = vsel %vm2993_vm11, %v535_v47, %v761_v29  ;;  %v826_v31 = vld [vmem:[#allocation2 + $0x3c] sm:$0x8]  ;;  %v963_v32 = vsel %vm2739_vm2, %v961_v4, %v3219_v20  ;;  %v3956_v30 = vshrl.u32 %v3955_v6, 16  ;;  %v3957_v8 = vld [vmem:[#allocation13_spill] sm:$0xff] }
  0xba   : > { %380 = vst.msk [vmem:[#allocation2 + $0x48] sm:$0xf] %vm363_vm3, %v299_v21  ;;  %v827_v39 = vsel %vm3023_vm14, 0, %v826_v31  ;;  %v417_v52 = vld [vmem:[#allocation2 + $0x38] sm:$0x1]  ;;  %v3958_v20 = vshrl.u32 %v3957_v8, 16  ;;  %v3402_v21 = vpop.permute.xlu2 %318 }
  0xbb   : > { %v652_v14 = vrot.slane %v3956_v30, 7  ;;  %763 = vst [vmem:[#allocation2 + $0x30] sm:$0xf] %v762_v12  ;;  %v418_v51 = vsel %vm2932_vm6, 0, %v417_v52  ;;  %v3383_v47 = vsel %vm2946_vm8, %v616_v27, %v623_v37  ;;  %v987_v37 = vor.u32 %v986_v44, %v985_v42  ;;  %v1123_v54 = vld [vmem:[#allocation2 + $0x34] sm:$0xf] }
  0xbc   : > { %828 = vst [vmem:[#allocation2 + $0x3c] sm:$0x8] %v827_v39  ;;  %1047 = vrot.lane.b32.xlu2 %v963_v32, %s2490_s21  ;;  %v3388_v0 = vrot.slane %v3958_v20, 7  ;;  %v429_v2 = vld [vmem:[#allocation2 + $0x58] sm:$0x1]  ;;  %v3959_v27 = vshll.u32 %v3955_v6, 16 }
  0xbd   : > { %419 = vst [vmem:[#allocation2 + $0x38] sm:$0x1] %v418_v51  ;;  %1051 = vrot.lane.b32.xlu0 %v972_v36, %s2490_s21  ;;  %1055 = vrot.lane.b32.xlu1 %v981_v16, %s2490_s21  ;;  %v430_v46 = vsel %vm2932_vm6, 0, %v429_v2  ;;  %v988_v3 = vrot.slane %v987_v37, 4  ;;  %v3961_v16 = vshll.u32 %v3960_v40, 16  ;;  %v3962_v42 = vshrl.u32 %v2792_v59, 16 }
  0xbe   : > { %379 = vst.msk [vmem:[#allocation2 + $0x44] sm:$0xf] %vm363_vm3, %v297_v17  ;;  %v655_v19 = vor.u32 %v3959_v27, %v652_v14  ;;  %v648_v13 = vrot.slane %v3388_v0, 4  ;;  %v684_v12 = vrot.slane %v682_v9, 7  ;;  %v3963_v31 = vshll.u32 %v2703_v24, 16 }
  0xbf   : > { %772 = vst.msk [vmem:[#allocation2 + $0x44] sm:$0xf] %vm737_vm9, %v3291_v11  ;;  %v305_v36 = vpop.permute.xlu1 %304  ;;  %v303_v35 = vpop.permute.xlu0 %302  ;;  %v551_v17 = vor.u32 %v3961_v16, %v2980_v45  ;;  %v990_v11 = vsel %vm2739_vm2, %v988_v3, %v3282_v41  ;;  %v668_v44 = vrot.slane %v3962_v42, 7  ;;  %v3439_v41 = vrot.slane %v658_v25, 7 }
  0xc0   : > { %431 = vst [vmem:[#allocation2 + $0x58] sm:$0x1] %v430_v46  ;;  %v656_v45 = vsel %vm2946_vm8, %v648_v13, %v655_v19  ;;  %v615_v32 = vor.u32 %v3963_v31, %v612_v63  ;;  %v3966_v39 = vshll.u32 %v2792_v59, 16  ;;  %v687_v48 = vor.u32 %v685_v15, %v684_v12 }
  0xc1   : > { %v423_v4 = vld [vmem:[#allocation2 + $0x48] sm:$0x1]  ;;  %383 = vst.msk [vmem:[#allocation2 + $0x54] sm:$0xf] %vm363_vm3, %v305_v36  ;;  %v664_v38 = vrot.slane %v3439_v41, 4  ;;  %v700_v15 = vrot.slane %v698_v7, 7  ;;  %v631_v12 = vor.u32 %v629_v34, %v3312_v53 }
  0xc2   : > { %v424_v29 = vsel %vm2932_vm6, 0, %v423_v4  ;;  %780 = vst.msk [vmem:[#allocation2 + $0x54] sm:$0xf] %vm737_vm9, %v3295_v5  ;;  %v3433_v5 = vrot.slane %v674_v23, 7  ;;  %v325_v24 = vpop.permute.xlu2 %324  ;;  %v3964_v23 = vld [vmem:[#allocation9_spill] sm:$0xff]  ;;  %v671_v52 = vor.u32 %v3966_v39, %v668_v44  ;;  %v3967_v19 = vshrl.u32 %v2833_v56, 16 }
  0xc3   : > { %425 = vst [vmem:[#allocation2 + $0x48] sm:$0x1] %v424_v29  ;;  %v3965_v63 = vshll.u32 %v3964_v23, 16  ;;  %v703_v3 = vor.u32 %v701_v22, %v700_v15  ;;  %v3968_v4 = vld [vmem:[#allocation10_spill] sm:$0xff] }
  0xc4   : > { %v765_v6 = vld [vmem:[#allocation2 + $0x38] sm:$0xf]  ;;  %382 = vst.msk [vmem:[#allocation2 + $0x50] sm:$0xf] %vm363_vm3, %v303_v35  ;;  %1059 = vrot.lane.b32.xlu2 %v990_v11, %s2490_s21  ;;  %v680_v25 = vrot.slane %v3433_v5, 4  ;;  %v672_v46 = vsel %vm2946_vm8, %v664_v38, %v671_v52  ;;  %v3481_v13 = vrot.slane %v3967_v19, 7 }
  0xc5   : > { %v766_v9 = vsel %vm2993_vm11, %v551_v17, %v765_v6  ;;  %1063 = vrot.lane.b32.xlu0 %v999_v18, %s2490_s21  ;;  %v583_v30 = vor.u32 %v3965_v63, %v2990_v57  ;;  %788 = vst.msk [vmem:[#allocation2 + $0x64] sm:$0xf] %vm737_vm9, %v3357_v55  ;;  %v3969_v29 = vshll.u32 %v3968_v4, 16 }
  0xc6   : > { %767 = vst [vmem:[#allocation2 + $0x38] sm:$0xf] %v766_v9  ;;  %v829_v14 = vld [vmem:[#allocation2 + $0x44] sm:$0x8]  ;;  %v688_v37 = vsel %vm2946_vm8, %v680_v25, %v687_v48  ;;  %v696_v35 = vrot.slane %v3481_v13, 4 }
  0xc7   : > { %v830_v50 = vsel %vm3023_vm14, 0, %v829_v14  ;;  %v781_v18 = vld [vmem:[#allocation2 + $0x58] sm:$0xf]  ;;  %v311_v57 = vpop.permute.xlu1 %310  ;;  %v309_v33 = vpop.permute.xlu0 %308  ;;  %v599_v11 = vor.u32 %v3969_v29, %v3056_v10  ;;  %390 = vst.msk [vmem:[#allocation2 + $0x70] sm:$0xf] %vm363_vm3, %v3402_v21 }
  0xc8   : > { %831 = vst [vmem:[#allocation2 + $0x44] sm:$0x8] %v830_v50  ;;  %v782_v51 = vsel %vm2993_vm11, %v615_v32, %v781_v18  ;;  %v704_v22 = vsel %vm2946_vm8, %v696_v35, %v703_v3  ;;  %v3971_v50 = vshll.u32 %v3957_v8, 16  ;;  %v3974_v3 = vshll.u32 %v2833_v56, 16 }
  0xc9   : > { %783 = vst [vmem:[#allocation2 + $0x58] sm:$0xf] %v782_v51  ;;  %v835_v59 = vld [vmem:[#allocation2 + $0x54] sm:$0x8] }
  0xca   : > { %v773_v20 = vld [vmem:[#allocation2 + $0x48] sm:$0xf]  ;;  %v836_v62 = vsel %vm3023_vm14, 0, %v835_v59  ;;  %386 = vst.msk [vmem:[#allocation2 + $0x60] sm:$0xf] %vm363_vm3, %v311_v57  ;;  %v3483_v7 = vpop.permute.xlu2 %1003  ;;  %v647_v18 = vor.u32 %v3971_v50, %v3388_v0 }
  0xcb   : > { %v774_v55 = vsel %vm2993_vm11, %v583_v30, %v773_v20  ;;  %837 = vst [vmem:[#allocation2 + $0x54] sm:$0x8] %v836_v62  ;;  %v426_v2 = vld [vmem:[#allocation2 + $0x50] sm:$0x1]  ;;  %v3970_v30 = vshll.u32 %v2772_v49, 16 }
  0xcc   : > { %775 = vst [vmem:[#allocation2 + $0x48] sm:$0xf] %v774_v55  ;;  %v427_v27 = vsel %vm2932_vm6, 0, %v426_v2  ;;  %v841_v36 = vld [vmem:[#allocation2 + $0x64] sm:$0x8] }
  0xcd   : > { %428 = vst [vmem:[#allocation2 + $0x50] sm:$0x1] %v427_v27  ;;  %v842_v40 = vsel %vm3023_vm14, 0, %v841_v36  ;;  %v663_v25 = vor.u32 %v3970_v30, %v3439_v41  ;;  %v1103_v59 = vld [vmem:[#allocation2 + $0xc] sm:$0xf] }
  0xce   : > { %385 = vst.msk [vmem:[#allocation2 + $0x5c] sm:$0xf] %vm363_vm3, %v309_v33  ;;  %v679_v33 = vor.u32 %v677_v43, %v3433_v5  ;;  %v1107_v62 = vld [vmem:[#allocation2 + $0x14] sm:$0xf] }
  0xcf   : > { %784 = vst.msk [vmem:[#allocation2 + $0x5c] sm:$0xf] %vm737_vm9, %v3383_v47  ;;  %v317_v16 = vpop.permute.xlu1 %316  ;;  %v315_v17 = vpop.permute.xlu0 %314  ;;  %v1131_v56 = vld [vmem:[#allocation2 + $0x44] sm:$0xf] }
  0xd0   : > { %843 = vst [vmem:[#allocation2 + $0x64] sm:$0x8] %v842_v40  ;;  %v695_v40 = vor.u32 %v3974_v3, %v3481_v13  ;;  %v1115_v13 = vld [vmem:[#allocation2 + $0x24] sm:$0xf] }
  0xd1   : > { %v432_v42 = vld [vmem:[#allocation2 + $0x60] sm:$0x1]  ;;  %389 = vst.msk [vmem:[#allocation2 + $0x6c] sm:$0xf] %vm363_vm3, %v317_v16  ;;  %v1119_v16 = vld [vmem:[#allocation2 + $0x2c] sm:$0xf] }
  0xd2   : > { %v433_v60 = vsel %vm2932_vm6, 0, %v432_v42  ;;  %792 = vst.msk [vmem:[#allocation2 + $0x6c] sm:$0xf] %vm737_vm9, %v656_v45  ;;  %v3507_v10 = vpop.permute.xlu2 %1009  ;;  %v438_v45 = vld [vmem:[#allocation2 + $0x70] sm:$0x1] }
  0xd3   : > { %434 = vst [vmem:[#allocation2 + $0x60] sm:$0x1] %v433_v60  ;;  %v439_v6 = vsel %vm2932_vm6, 0, %v438_v45  ;;  %v1127_v45 = vld [vmem:[#allocation2 + $0x3c] sm:$0xf] }
  0xd4   : > { %v777_v47 = vld [vmem:[#allocation2 + $0x50] sm:$0xf]  ;;  %388 = vst.msk [vmem:[#allocation2 + $0x68] sm:$0xf] %vm363_vm3, %v315_v17 }
  0xd5   : > { %v778_v44 = vsel %vm2993_vm11, %v599_v11, %v777_v47  ;;  %393 = vst.msk [vmem:[#allocation2 + $0x7c] sm:$0xf] %vm363_vm3, %v325_v24 }
  0xd6   : > { %779 = vst [vmem:[#allocation2 + $0x50] sm:$0xf] %v778_v44  ;;  %v838_v21 = vld [vmem:[#allocation2 + $0x5c] sm:$0x8] }
  0xd7   : > { %v839_v26 = vsel %vm3023_vm14, 0, %v838_v21  ;;  %v323_v31 = vpop.permute.xlu1 %322  ;;  %v321_v32 = vpop.permute.xlu0 %320  ;;  %440 = vst [vmem:[#allocation2 + $0x70] sm:$0x1] %v439_v6 }
  0xd8   : > { %840 = vst [vmem:[#allocation2 + $0x5c] sm:$0x8] %v839_v26 }
  0xd9   : > { %392 = vst.msk [vmem:[#allocation2 + $0x78] sm:$0xf] %vm363_vm3, %v323_v31  ;;  %v844_v34 = vld [vmem:[#allocation2 + $0x6c] sm:$0x8] }
  0xda   : > { %v785_v9 = vld [vmem:[#allocation2 + $0x60] sm:$0xf]  ;;  %391 = vst.msk [vmem:[#allocation2 + $0x74] sm:$0xf] %vm363_vm3, %v321_v32  ;;  %v845_v53 = vsel %vm3023_vm14, 0, %v844_v34  ;;  %v1016_v63 = vpop.permute.xlu2 %1015 }
  0xdb   : > { %v786_v28 = vsel %vm2993_vm11, %v631_v12, %v785_v9  ;;  %v435_v24 = vld [vmem:[#allocation2 + $0x68] sm:$0x1]  ;;  %846 = vst [vmem:[#allocation2 + $0x6c] sm:$0x8] %v845_v53  ;;  %v1147_v32 = vld [vmem:[#allocation2 + $0x64] sm:$0xf] }
  0xdc   : > { %787 = vst [vmem:[#allocation2 + $0x60] sm:$0xf] %v786_v28  ;;  %v436_v23 = vsel %vm2932_vm6, 0, %v435_v24 }
  0xdd   : > { %437 = vst [vmem:[#allocation2 + $0x68] sm:$0x1] %v436_v23  ;;  %v1135_v23 = vld [vmem:[#allocation2 + $0x4c] sm:$0xf] }
  0xde   : > { %796 = vst.msk [vmem:[#allocation2 + $0x74] sm:$0xf] %vm737_vm9, %v672_v46  ;;  %v793_v38 = vld [vmem:[#allocation2 + $0x70] sm:$0xf] }
  0xdf   : > { %v327_v14 = vpop.permute.xlu0 %326  ;;  %v329_v39 = vpop.permute.xlu1 %328  ;;  %800 = vst.msk [vmem:[#allocation2 + $0x7c] sm:$0xf] %vm737_vm9, %v688_v37  ;;  %v794_v49 = vsel %vm2993_vm11, %v663_v25, %v793_v38  ;;  %v1143_v38 = vld [vmem:[#allocation2 + $0x5c] sm:$0xf] }
  0xe0   : > { %v441_v52 = vld [vmem:[#allocation2 + $0x78] sm:$0x1]  ;;  %394 = vst.msk [vmem:[#allocation2 + $0x80] sm:$0xf] %vm363_vm3, %v327_v14 }
  0xe1   : > { %v442_v48 = vsel %vm2932_vm6, 0, %v441_v52  ;;  %795 = vst [vmem:[#allocation2 + $0x70] sm:$0xf] %v794_v49  ;;  %v1139_v52 = vld [vmem:[#allocation2 + $0x54] sm:$0xf] }
  0xe2   : > { %443 = vst [vmem:[#allocation2 + $0x78] sm:$0x1] %v442_v48  ;;  %v1022_v57 = vpop.permute.xlu2 %1021 }
  0xe3   : > { %395 = vst.msk [vmem:[#allocation2 + $0x84] sm:$0xf] %vm363_vm3, %v329_v39  ;;  %v1120_v11 = vsel %vm3547_vm1, %v1022_v57, %v1119_v16  ;;  %v2491_v57 = vmov 0  }
  0xe4   : > { %v789_v41 = vld [vmem:[#allocation2 + $0x68] sm:$0xf]  ;;  %804 = vst.msk [vmem:[#allocation2 + $0x84] sm:$0xf] %vm737_vm9, %v704_v22 }
  0xe5   : > { %v790_v8 = vsel %vm2993_vm11, %v647_v18, %v789_v41  ;;  %v847_v0 = vld [vmem:[#allocation2 + $0x74] sm:$0x8]  ;;  %1100 = vst.msk [vmem:[#allocation2 + $0x8] sm:$0xf] %vm1099_vm15, %v3483_v7  ;;  %v1108_v7 = vsel %vm3547_vm1, %v3507_v10, %v1107_v62 }
  0xe6   : > { %791 = vst [vmem:[#allocation2 + $0x68] sm:$0xf] %v790_v8  ;;  %v848_v20 = vsel %vm3023_vm14, 0, %v847_v0  ;;  %v850_v1 = vld [vmem:[#allocation2 + $0x7c] sm:$0x8] }
  0xe7   : > { %v1006_v43 = vpop.permute.xlu0 %1005  ;;  %v1008_v5 = vpop.permute.xlu1 %1007  ;;  %849 = vst [vmem:[#allocation2 + $0x74] sm:$0x8] %v848_v20  ;;  %v851_v15 = vsel %vm3023_vm14, 0, %v850_v1  ;;  %v444_v55 = vld [vmem:[#allocation2 + $0x80] sm:$0x1] }
  0xe8   : > { %852 = vst [vmem:[#allocation2 + $0x7c] sm:$0x8] %v851_v15  ;;  %v445_v46 = vsel %vm2932_vm6, 0, %v444_v55  ;;  %v1104_v37 = vsel %vm3547_vm1, %v1006_v43, %v1103_v59 }
  0xe9   : > { %v797_v2 = vld [vmem:[#allocation2 + $0x78] sm:$0xf]  ;;  %446 = vst [vmem:[#allocation2 + $0x80] sm:$0x1] %v445_v46 }
  0xea   : > { %v798_v27 = vsel %vm2993_vm11, %v679_v33, %v797_v2  ;;  %1105 = vst [vmem:[#allocation2 + $0xc] sm:$0xf] %v1104_v37  ;;  %v1028_v35 = vpop.permute.xlu2 %1027  ;;  %v1151_v33 = vld [vmem:[#allocation2 + $0x6c] sm:$0xf] }
  0xeb   : > { %799 = vst [vmem:[#allocation2 + $0x78] sm:$0xf] %v798_v27  ;;  %v853_v19 = vld [vmem:[#allocation2 + $0x84] sm:$0x8] }
  0xec   : > { %v854_v36 = vsel %vm3023_vm14, 0, %v853_v19  ;;  %1106 = vst.msk [vmem:[#allocation2 + $0x10] sm:$0xf] %vm1099_vm15, %v1008_v5 }
  0xed   : > { %855 = vst [vmem:[#allocation2 + $0x84] sm:$0x8] %v854_v36 }
  0xee   : > { %1109 = vst [vmem:[#allocation2 + $0x14] sm:$0xf] %v1108_v7  ;;  %v1155_v8 = vld [vmem:[#allocation2 + $0x74] sm:$0xf] }
  0xef   : > { %v1012_v17 = vpop.permute.xlu0 %1011  ;;  %v1014_v4 = vpop.permute.xlu1 %1013  ;;  %1114 = vst.msk [vmem:[#allocation2 + $0x20] sm:$0xf] %vm1099_vm15, %v1016_v63  ;;  %v1159_v24 = vld [vmem:[#allocation2 + $0x7c] sm:$0xf] }
  0xf0   : > { %1110 = vst.msk [vmem:[#allocation2 + $0x18] sm:$0xf] %vm1099_vm15, %v1012_v17  ;;  %v1112_v29 = vsel %vm3547_vm1, %v1014_v4, %v1111_v58  ;;  %v801_v61 = vld [vmem:[#allocation2 + $0x80] sm:$0xf] }
  0xf1   : > { %1113 = vst [vmem:[#allocation2 + $0x1c] sm:$0xf] %v1112_v29  ;;  %v802_v42 = vsel %vm2993_vm11, %v695_v40, %v801_v61 }
  0xf2   : > { %803 = vst [vmem:[#allocation2 + $0x80] sm:$0xf] %v802_v42  ;;  %v1034_v60 = vpop.permute.xlu2 %1033 }
  0xf3   : > { %1121 = vst [vmem:[#allocation2 + $0x2c] sm:$0xf] %v1120_v11  ;;  %v1132_v22 = vsel %vm3547_vm1, %v1034_v60, %v1131_v56 }
  0xf4   : > { %1126 = vst.msk [vmem:[#allocation2 + $0x38] sm:$0xf] %vm1099_vm15, %v1028_v35  ;;  %v1163_v5 = vld [vmem:[#allocation2 + $0x84] sm:$0xf] }
  0xf5   : > { %1133 = vst [vmem:[#allocation2 + $0x44] sm:$0xf] %v1132_v22 }
  0xf6   : > { %1171 = vst.msk [vmem:[#allocation2] sm:$0xf] %vm1170_vm0, %v2491_v57 }
  0xf7   : > { %v1018_v47 = vpop.permute.xlu0 %1017  ;;  %v1020_v44 = vpop.permute.xlu1 %1019  ;;  %1172 = vst.msk [vmem:[#allocation2 + $0x4] sm:$0xf] %vm1170_vm0, %v2491_v57 }
  0xf8   : > { %v1116_v10 = vsel %vm3547_vm1, %v1018_v47, %v1115_v13  ;;  %1118 = vst.msk [vmem:[#allocation2 + $0x28] sm:$0xf] %vm1099_vm15, %v1020_v44 }
  0xf9   : > { %1117 = vst [vmem:[#allocation2 + $0x24] sm:$0xf] %v1116_v10 }
  0xfa   : > { %1245 = vst.msk [vmem:[#allocation2 + $0x88] sm:$0xf] %vm1170_vm0, %v2491_v57 }
  0xfb   : > { %1246 = vst.msk [vmem:[#allocation2 + $0x8c] sm:$0xf] %vm1170_vm0, %v2491_v57 }
  0xfd   : > { %v1040_v21 = vpop.permute.xlu2 %1039 }
  0xfe   : > { %1138 = vst.msk [vmem:[#allocation2 + $0x50] sm:$0xf] %vm1099_vm15, %v1040_v21 }
  0xff   : > { %v1024_v12 = vpop.permute.xlu0 %1023  ;;  %v1026_v26 = vpop.permute.xlu1 %1025 }
 0x100   : > { %1122 = vst.msk [vmem:[#allocation2 + $0x30] sm:$0xf] %vm1099_vm15, %v1024_v12  ;;  %v1124_v31 = vsel %vm3547_vm1, %v1026_v26, %v1123_v54 }
 0x101   : > { %1125 = vst [vmem:[#allocation2 + $0x34] sm:$0xf] %v1124_v31 }
 0x106   : > { %v1050_v6 = vpop.permute.xlu2 %1049 }
 0x107   : > { %v1030_v9 = vpop.permute.xlu0 %1029  ;;  %v1032_v28 = vpop.permute.xlu1 %1031  ;;  %v1148_v34 = vsel %vm3547_vm1, %v1050_v6, %v1147_v32 }
 0x108   : > { %v1128_v53 = vsel %vm3547_vm1, %v1030_v9, %v1127_v45  ;;  %1130 = vst.msk [vmem:[#allocation2 + $0x40] sm:$0xf] %vm1099_vm15, %v1032_v28 }
 0x109   : > { %1129 = vst [vmem:[#allocation2 + $0x3c] sm:$0xf] %v1128_v53 }
 0x10a   : > { %1149 = vst [vmem:[#allocation2 + $0x64] sm:$0xf] %v1148_v34 }
 0x10e   : > { %v1062_v63 = vpop.permute.xlu2 %1061 }
 0x10f   : > { %v1036_v30 = vpop.permute.xlu0 %1035  ;;  %v1038_v25 = vpop.permute.xlu1 %1037  ;;  %v1160_v14 = vsel %vm3547_vm1, %v1062_v63, %v1159_v24 }
 0x110   : > { %1134 = vst.msk [vmem:[#allocation2 + $0x48] sm:$0xf] %vm1099_vm15, %v1036_v30  ;;  %v1136_v39 = vsel %vm3547_vm1, %v1038_v25, %v1135_v23 }
 0x111   : > { %1137 = vst [vmem:[#allocation2 + $0x4c] sm:$0xf] %v1136_v39 }
 0x112   : > { %1161 = vst [vmem:[#allocation2 + $0x7c] sm:$0xf] %v1160_v14 }
 0x116   : > { %v1048_v48 = vpop.permute.xlu2 %1047 }
 0x117   : > { %v1042_v50 = vpop.permute.xlu0 %1041  ;;  %v1046_v18 = vpop.permute.xlu1 %1045  ;;  %1146 = vst.msk [vmem:[#allocation2 + $0x60] sm:$0xf] %vm1099_vm15, %v1048_v48 }
 0x118   : > { %v1140_v49 = vsel %vm3547_vm1, %v1042_v50, %v1139_v52  ;;  %v1144_v41 = vsel %vm3547_vm1, %v1046_v18, %v1143_v38 }
 0x119   : > { %1141 = vst [vmem:[#allocation2 + $0x54] sm:$0xf] %v1140_v49 }
 0x11a   : > { %1145 = vst [vmem:[#allocation2 + $0x5c] sm:$0xf] %v1144_v41 }
 0x11e   : > { %v1060_v0 = vpop.permute.xlu2 %1059 }
 0x11f   : > { %v1054_v59 = vpop.permute.xlu0 %1053  ;;  %v1058_v20 = vpop.permute.xlu1 %1057  ;;  %1158 = vst.msk [vmem:[#allocation2 + $0x78] sm:$0xf] %vm1099_vm15, %v1060_v0 }
 0x120   : > { %v1152_v1 = vsel %vm3547_vm1, %v1054_v59, %v1151_v33  ;;  %v1156_v43 = vsel %vm3547_vm1, %v1058_v20, %v1155_v8 }
 0x121   : > { %1153 = vst [vmem:[#allocation2 + $0x6c] sm:$0xf] %v1152_v1 }
 0x122   : > { %1157 = vst [vmem:[#allocation2 + $0x74] sm:$0xf] %v1156_v43 }
 0x127   : > { %v1066_v62 = vpop.permute.xlu0 %1065  ;;  %v1044_v15 = vpop.permute.xlu1 %1043 }
 0x128   : > { %v1164_v55 = vsel %vm3547_vm1, %v1066_v62, %v1163_v5  ;;  %1142 = vst.msk [vmem:[#allocation2 + $0x58] sm:$0xf] %vm1099_vm15, %v1044_v15 }
 0x129   : > { %1165 = vst [vmem:[#allocation2 + $0x84] sm:$0xf] %v1164_v55 }
 0x12f   : > { %v1052_v2 = vpop.permute.xlu0 %1051  ;;  %v1056_v46 = vpop.permute.xlu1 %1055 }
 0x130   : > { %1150 = vst.msk [vmem:[#allocation2 + $0x68] sm:$0xf] %vm1099_vm15, %v1052_v2 }
 0x131   : > { %1154 = vst.msk [vmem:[#allocation2 + $0x70] sm:$0xf] %vm1099_vm15, %v1056_v46 }
 0x137   : > { %v1064_v37 = vpop.permute.xlu0 %1063 }
 0x138   : > { %1162 = vst.msk [vmem:[#allocation2 + $0x80] sm:$0xf] %vm1099_vm15, %v1064_v37 }
 0x139 PF: > { %s2292_s24 = smul.u32 24, %s2471_s15  ;;  %vm1536_vm2 = vcmask 1043456   ;;  %s2061_s5 = sshll.u32 %s2471_s15, 3  ;;  %vm1487_vm3 = vcmask 195584   ;;  %v3690_v38 = vld [vmem:[%s3836_s2] ss:$0 sm:$0xff] }
 0x13a   : > { %s3621_s6 = scalar_lea.vmem [#allocation2], %s2061_s5  ;;  %vm1894_vm4 = vcmask 130048   ;;  %s2270_s9 = sshll.u32 %s2471_s15, 5 }
 0x13b   : > { %s1353_s29 = scalar_lea.vmem %s3835_s1, %s2292_s24  ;;  %s2271_s10 = sshll.u32 %s2475_s16, 6 }
 0x13c   : > { %v2100_v51 = vld [vmem:[%s1353_s29 + $0x14] sm:$0xf]  ;;  %v1356_v27 = vld [vmem:[%s1353_s29 + $0x8] sm:$0xf]  ;;  %v2311_v40 = vld [vmem:[%s1353_s29 + $0xc] sm:$0xff]  ;;  %s1942_s20 = sadd.s32 %s2271_s10, %s2270_s9  ;;  %s1945_s27 = sshll.u32 %s2595_s11, 4  ;;  %s1946_s27 = int_to_ptr.vmem [resolvable:$true] %s1945_s27 }
 0x13d   : > { %v1483_v19 = vunpack.c.l.b16 %v2100_v51  ;;  %v1714_v7 = vunpack.c.l.b16 %v1356_v27  ;;  %v2293_v16 = vld [vmem:[%s1353_s29] sm:$0xff]  ;;  %s2272_s21 = sshll.u32 %s1942_s20, 3  ;;  %s1928_s29 = scalar_lea.sflag [#allocation4], %s184_s4 }
 0x13e   : > { %s1944_s24 = scalar_lea.hbm %s3837_s3, %s2272_s21  ;;  %s2413_s9 = scalar_lea.hbm %s3837_s3, 1024 }
 0x13f   : > { %v1485_v36 = vpack.c.b16 %v1483_v19, %v1483_v19  ;;  %v1716_v58 = vpack.c.b16 %v1714_v7, %v1714_v7  ;;  %v2295_v17 = vld [vmem:[%s3621_s6] sm:$0xff]  ;;  %v2276_v29 = vld [vmem:[%s3621_s6 + $0x8] sm:$0xff]  ;;  %v2277_v56 = vld [vmem:[%s3621_s6 + $0x10] sm:$0xff]  ;;  %s1947_s28 = sshll.u32 %s1944_s24, 4  ;;  %s1948_s28 = int_to_ptr.hbm [resolvable:$true] %s1947_s28 }
 0x140   : > { %v2303_v4 = vld [vmem:[%s3621_s6 + $0x40] sm:$0xff]  ;;  %v2284_v61 = vld [vmem:[%s3621_s6 + $0x48] sm:$0xff]  ;;  %v2285_v13 = vld [vmem:[%s3621_s6 + $0x50] sm:$0xff]  ;;  %s2407_s5 = sshra.s32 %s1948_s28, 4  ;;  %s2408_s5 = int_to_ptr.hbm [resolvable:$true] %s2407_s5 }
 0x141   : > { %v1538_v35 = vsel %vm1536_vm2, %v1485_v36, 0  ;;  %v1767_v3 = vsel %vm1536_vm2, %v1716_v58, 0  ;;  %v2296_v11 = vld [vmem:[%s3621_s6 + $0x8] sm:$0xff]  ;;  %v2297_v60 = vld [vmem:[%s3621_s6 + $0x10] sm:$0xff]  ;;  %v2278_v47 = vld [vmem:[%s3621_s6 + $0x18] sm:$0xff]  ;;  %p2414_p4 = scmp.lt.s32.totalorder %s2408_s5, %s3837_s3 }
 0x142   : > { %1546 = vmatpush.bf16.msra.mxu0 %v1538_v35  ;;  %2312 = vmatpush.bf16.msra.mxu2 %v1538_v35  ;;  %v2304_v42 = vld [vmem:[%s3621_s6 + $0x48] sm:$0xff]  ;;  %v2305_v22 = vld [vmem:[%s3621_s6 + $0x50] sm:$0xff]  ;;  %v2286_v44 = vld [vmem:[%s3621_s6 + $0x58] sm:$0xff] }
 0x143   : > { %1775 = vmatpush.bf16.msra.mxu1 %v1767_v3  ;;  %2314 = vmatpush.bf16.msra.mxu3 %v1767_v3  ;;  %v2298_v10 = vld [vmem:[%s3621_s6 + $0x18] sm:$0xff]  ;;  %v2279_v21 = vld [vmem:[%s3621_s6 + $0x20] sm:$0xff]  ;;  %v2280_v32 = vld [vmem:[%s3621_s6 + $0x28] sm:$0xff] }
 0x144   : > { %v2306_v54 = vld [vmem:[%s3621_s6 + $0x58] sm:$0xff]  ;;  %v2287_v12 = vld [vmem:[%s3621_s6 + $0x60] sm:$0xff]  ;;  %v2288_v45 = vld [vmem:[%s3621_s6 + $0x68] sm:$0xff] }
 0x145   : > { %v2299_v26 = vld [vmem:[%s3621_s6 + $0x20] sm:$0xff]  ;;  %v2300_v6 = vld [vmem:[%s3621_s6 + $0x28] sm:$0xff]  ;;  %v2281_v28 = vld [vmem:[%s3621_s6 + $0x30] sm:$0xff] }
 0x146   : > { %1547 = vmatpush.bf16.msra.mxu0 %v2311_v40  ;;  %2313 = vmatpush.bf16.msra.mxu2 %v2311_v40  ;;  %v2307_v31 = vld [vmem:[%s3621_s6 + $0x60] sm:$0xff]  ;;  %v2308_v9 = vld [vmem:[%s3621_s6 + $0x68] sm:$0xff]  ;;  %v2289_v34 = vld [vmem:[%s3621_s6 + $0x70] sm:$0xff] }
 0x147   : > { %1776 = vmatpush.bf16.msra.mxu1 %v2293_v16  ;;  %2315 = vmatpush.bf16.msra.mxu3 %v2293_v16  ;;  %v2301_v53 = vld [vmem:[%s3621_s6 + $0x30] sm:$0xff]  ;;  %v2282_v23 = vld [vmem:[%s3621_s6 + $0x38] sm:$0xff]  ;;  %v2283_v14 = vld [vmem:[%s3621_s6 + $0x40] sm:$0xff] }
 0x148   : > { %v2309_v24 = vld [vmem:[%s3621_s6 + $0x70] sm:$0xff]  ;;  %v2290_v63 = vld [vmem:[%s3621_s6 + $0x78] sm:$0xff]  ;;  %v2291_v39 = vld [vmem:[%s3621_s6 + $0x80] sm:$0xff] }
 0x149   : > { %2169 = vmatmul.msk.bf16.vlgmr.msra.gmra.mxu0 %vm1487_vm3, %v2295_v17  ;;  %2177 = vmatmul.msk.bf16.vlgmr.msra.gmra.mxu2 %vm1487_vm3, %v2303_v4  ;;  %v2302_v30 = vld [vmem:[%s3621_s6 + $0x38] sm:$0xff] }
 0x14a   : > { %2253 = vmatmul.msk.bf16.vlgmr.msra.gmra.mxu1 %vm1487_vm3, %v2276_v29  ;;  %2261 = vmatmul.msk.bf16.vlgmr.msra.gmra.mxu3 %vm1487_vm3, %v2284_v61  ;;  %v2310_v25 = vld [vmem:[%s3621_s6 + $0x78] sm:$0xff]  ;;  %s2409_s6 = scalar_lea.hbm %s2408_s5, 256 }
 0x14b   : > { %p2410_p0 = scmp.ne.s32.totalorder %s2408_s5, %s2409_s6  ;;  %p2415_p5 = scmp.lt.s32.totalorder %s2413_s9, %s2409_s6 }
 0x14d   : > { %p2411_p1 = pnand %p2410_p0, %p2565_p3  ;;  %p2416_p6 = por %p2415_p5, %p2414_p4 }
 0x14f   : > { %p2412_p2 = pneg %p2411_p1 }
 0x151   : > { %p2417_p7 = pnand %p2416_p6, %p2412_p2 }
 0x159   : > { %2170 = vmatmul.msk.bf16.gmra.mxu0 %vm1487_vm3, %v2296_v11  ;;  %2178 = vmatmul.msk.bf16.gmra.mxu2 %vm1487_vm3, %v2304_v42 }
 0x15a   : > { %2254 = vmatmul.msk.bf16.gmra.mxu1 %vm1487_vm3, %v2277_v56  ;;  %2262 = vmatmul.msk.bf16.gmra.mxu3 %vm1487_vm3, %v2285_v13 }
 0x169   : > { %2171 = vmatmul.msk.bf16.gmra.mxu0 %vm1487_vm3, %v2297_v60  ;;  %2179 = vmatmul.msk.bf16.gmra.mxu2 %vm1487_vm3, %v2305_v22 }
 0x16a   : > { %2255 = vmatmul.msk.bf16.gmra.mxu1 %vm1487_vm3, %v2278_v47  ;;  %2263 = vmatmul.msk.bf16.gmra.mxu3 %vm1487_vm3, %v2286_v44 }
 0x179   : > { %2172 = vmatmul.msk.bf16.gmra.mxu0 %vm1487_vm3, %v2298_v10  ;;  %2180 = vmatmul.msk.bf16.gmra.mxu2 %vm1487_vm3, %v2306_v54 }
 0x17a   : > { %2256 = vmatmul.msk.bf16.gmra.mxu1 %vm1487_vm3, %v2279_v21  ;;  %2264 = vmatmul.msk.bf16.gmra.mxu3 %vm1487_vm3, %v2287_v12 }
 0x189   : > { %2173 = vmatmul.msk.bf16.gmra.mxu0 %vm1487_vm3, %v2299_v26  ;;  %2181 = vmatmul.msk.bf16.gmra.mxu2 %vm1487_vm3, %v2307_v31 }
 0x18a   : > { %2257 = vmatmul.msk.bf16.gmra.mxu1 %vm1487_vm3, %v2280_v32  ;;  %2265 = vmatmul.msk.bf16.gmra.mxu3 %vm1487_vm3, %v2288_v45 }
 0x199   : > { %2174 = vmatmul.msk.bf16.gmra.mxu0 %vm1487_vm3, %v2300_v6  ;;  %2182 = vmatmul.msk.bf16.gmra.mxu2 %vm1487_vm3, %v2308_v9 }
 0x19a   : > { %2258 = vmatmul.msk.bf16.gmra.mxu1 %vm1487_vm3, %v2281_v28  ;;  %2266 = vmatmul.msk.bf16.gmra.mxu3 %vm1487_vm3, %v2289_v34 }
 0x1a9   : > { %2175 = vmatmul.msk.bf16.gmra.mxu0 %vm1487_vm3, %v2301_v53  ;;  %2183 = vmatmul.msk.bf16.gmra.mxu2 %vm1487_vm3, %v2309_v24 }
 0x1aa   : > { %2259 = vmatmul.msk.bf16.gmra.mxu1 %vm1487_vm3, %v2282_v23  ;;  %2267 = vmatmul.msk.bf16.gmra.mxu3 %vm1487_vm3, %v2290_v63 }
 0x1b9   : > { %2176 = vmatmul.msk.bf16.gmra.mxu0 %vm1487_vm3, %v2302_v30  ;;  %2184 = vmatmul.msk.bf16.gmra.mxu2 %vm1487_vm3, %v2310_v25 }
 0x1ba   : > { %2260 = vmatmul.msk.bf16.gmra.mxu1 %vm1487_vm3, %v2283_v14  ;;  %2268 = vmatmul.msk.bf16.gmra.mxu3 %vm1487_vm3, %v2291_v39 }
 0x1c6   : > { %v1549_v52 = vpop.f32.mrf.mxu0 }
 0x1c7   : > { %v1778_v48 = vpop.f32.mrf.mxu1 }
 0x1c8   : > { %v1779_v50 = vadd.f32 %v1778_v48, %v1549_v52 }
 0x1ca   : > { %v1862_v18 = vadd.f32 %v3690_v38, %v1779_v50 }
 0x1cc   : > { %1895 = vst.msk [vmem:[%s2595_s11] sm:$0xff] %vm1894_vm4, %v1862_v18  ;;  %v1589_v49 = vpop.f32.mrf.mxu2 }
 0x1cd   : > { %v1818_v41 = vpop.f32.mrf.mxu3 }
 0x1ce   : > { %v1819_v57 = vadd.f32 %v1818_v41, %v1589_v49  ;;  %v1551_v33 = vpop.f32.mrf.mxu0 }
 0x1cf   : > { %v1780_v8 = vpop.f32.mrf.mxu1 }
 0x1d0   : > { %v1878_v0 = vadd.f32 %v3690_v38, %v1819_v57  ;;  %v1781_v59 = vadd.f32 %v1780_v8, %v1551_v33 }
 0x1d2   : > { %1911 = vst.msk [vmem:[%s2595_s11 + $0x80] sm:$0xff] %vm1894_vm4, %v1878_v0  ;;  %v1863_v20 = vadd.f32 %v3690_v38, %v1781_v59 }
 0x1d4   : > { %1896 = vst.msk [vmem:[%s2595_s11 + $0x8] sm:$0xff] %vm1894_vm4, %v1863_v20  ;;  %v1591_v1 = vpop.f32.mrf.mxu2 }
 0x1d5   : > { %v1820_v43 = vpop.f32.mrf.mxu3 }
 0x1d6   : > { %v1821_v5 = vadd.f32 %v1820_v43, %v1591_v1  ;;  %v1554_v62 = vpop.f32.mrf.mxu0 }
 0x1d7   : > { %v1783_v15 = vpop.f32.mrf.mxu1 }
 0x1d8   : > { %v1879_v55 = vadd.f32 %v3690_v38, %v1821_v5  ;;  %v1784_v2 = vadd.f32 %v1783_v15, %v1554_v62 }
 0x1da   : > { %1912 = vst.msk [vmem:[%s2595_s11 + $0x88] sm:$0xff] %vm1894_vm4, %v1879_v55  ;;  %v1864_v46 = vadd.f32 %v3690_v38, %v1784_v2 }
 0x1dc   : > { %1897 = vst.msk [vmem:[%s2595_s11 + $0x10] sm:$0xff] %vm1894_vm4, %v1864_v46  ;;  %v1594_v37 = vpop.f32.mrf.mxu2 }
 0x1dd   : > { %v1823_v51 = vpop.f32.mrf.mxu3 }
 0x1de   : > { %v1824_v27 = vadd.f32 %v1823_v51, %v1594_v37  ;;  %v1556_v19 = vpop.f32.mrf.mxu0 }
 0x1df   : > { %v1785_v7 = vpop.f32.mrf.mxu1 }
 0x1e0   : > { %v1880_v36 = vadd.f32 %v3690_v38, %v1824_v27  ;;  %v1786_v58 = vadd.f32 %v1785_v7, %v1556_v19 }
 0x1e2   : > { %1913 = vst.msk [vmem:[%s2595_s11 + $0x90] sm:$0xff] %vm1894_vm4, %v1880_v36  ;;  %v1865_v35 = vadd.f32 %v3690_v38, %v1786_v58 }
 0x1e4   : > { %1898 = vst.msk [vmem:[%s2595_s11 + $0x18] sm:$0xff] %vm1894_vm4, %v1865_v35  ;;  %v1596_v3 = vpop.f32.mrf.mxu2 }
 0x1e5   : > { %v1825_v40 = vpop.f32.mrf.mxu3 }
 0x1e6   : > { %v1826_v16 = vadd.f32 %v1825_v40, %v1596_v3  ;;  %v1559_v17 = vpop.f32.mrf.mxu0 }
 0x1e7   : > { %v1788_v4 = vpop.f32.mrf.mxu1 }
 0x1e8   : > { %v1881_v29 = vadd.f32 %v3690_v38, %v1826_v16  ;;  %v1789_v61 = vadd.f32 %v1788_v4, %v1559_v17 }
 0x1ea   : > { %1914 = vst.msk [vmem:[%s2595_s11 + $0x98] sm:$0xff] %vm1894_vm4, %v1881_v29  ;;  %v1866_v11 = vadd.f32 %v3690_v38, %v1789_v61 }
 0x1ec   : > { %1899 = vst.msk [vmem:[%s2595_s11 + $0x20] sm:$0xff] %vm1894_vm4, %v1866_v11  ;;  %v1599_v42 = vpop.f32.mrf.mxu2 }
 0x1ed   : > { %v1828_v56 = vpop.f32.mrf.mxu3 }
 0x1ee   : > { %v1829_v13 = vadd.f32 %v1828_v56, %v1599_v42  ;;  %v1561_v60 = vpop.f32.mrf.mxu0 }
 0x1ef   : > { %v1790_v22 = vpop.f32.mrf.mxu1 }
 0x1f0   : > { %v1882_v47 = vadd.f32 %v3690_v38, %v1829_v13  ;;  %v1791_v44 = vadd.f32 %v1790_v22, %v1561_v60 }
 0x1f2   : > { %1915 = vst.msk [vmem:[%s2595_s11 + $0xa0] sm:$0xff] %vm1894_vm4, %v1882_v47  ;;  %v1867_v10 = vadd.f32 %v3690_v38, %v1791_v44 }
 0x1f4   : > { %1900 = vst.msk [vmem:[%s2595_s11 + $0x28] sm:$0xff] %vm1894_vm4, %v1867_v10  ;;  %v1601_v54 = vpop.f32.mrf.mxu2 }
 0x1f5   : > { %v1830_v21 = vpop.f32.mrf.mxu3 }
 0x1f6   : > { %v1831_v12 = vadd.f32 %v1830_v21, %v1601_v54  ;;  %v1564_v26 = vpop.f32.mrf.mxu0 }
 0x1f7   : > { %v1793_v31 = vpop.f32.mrf.mxu1 }
 0x1f8   : > { %v1883_v32 = vadd.f32 %v3690_v38, %v1831_v12  ;;  %v1794_v45 = vadd.f32 %v1793_v31, %v1564_v26 }
 0x1fa   : > { %1916 = vst.msk [vmem:[%s2595_s11 + $0xa8] sm:$0xff] %vm1894_vm4, %v1883_v32  ;;  %v1868_v6 = vadd.f32 %v3690_v38, %v1794_v45 }
 0x1fc   : > { %1901 = vst.msk [vmem:[%s2595_s11 + $0x30] sm:$0xff] %vm1894_vm4, %v1868_v6  ;;  %v1604_v9 = vpop.f32.mrf.mxu2 }
 0x1fd   : > { %v1833_v28 = vpop.f32.mrf.mxu3 }
 0x1fe   : > { %v1834_v34 = vadd.f32 %v1833_v28, %v1604_v9  ;;  %v1566_v53 = vpop.f32.mrf.mxu0 }
 0x1ff   : > { %v1795_v24 = vpop.f32.mrf.mxu1 }
 0x200   : > { %v1884_v23 = vadd.f32 %v3690_v38, %v1834_v34  ;;  %v1796_v63 = vadd.f32 %v1795_v24, %v1566_v53 }
 0x202   : > { %1917 = vst.msk [vmem:[%s2595_s11 + $0xb0] sm:$0xff] %vm1894_vm4, %v1884_v23  ;;  %v1869_v30 = vadd.f32 %v3690_v38, %v1796_v63 }
 0x204   : > { %1902 = vst.msk [vmem:[%s2595_s11 + $0x38] sm:$0xff] %vm1894_vm4, %v1869_v30  ;;  %v1606_v25 = vpop.f32.mrf.mxu2 }
 0x205   : > { %v1835_v14 = vpop.f32.mrf.mxu3 }
 0x206   : > { %v1836_v39 = vadd.f32 %v1835_v14, %v1606_v25  ;;  %v1569_v52 = vpop.f32.mrf.mxu0 }
 0x207   : > { %v1798_v48 = vpop.f32.mrf.mxu1 }
 0x208   : > { %v1885_v50 = vadd.f32 %v3690_v38, %v1836_v39  ;;  %v1799_v18 = vadd.f32 %v1798_v48, %v1569_v52 }
 0x20a   : > { %1918 = vst.msk [vmem:[%s2595_s11 + $0xb8] sm:$0xff] %vm1894_vm4, %v1885_v50  ;;  %v1870_v49 = vadd.f32 %v3690_v38, %v1799_v18 }
 0x20c   : > { %1903 = vst.msk [vmem:[%s2595_s11 + $0x40] sm:$0xff] %vm1894_vm4, %v1870_v49  ;;  %v1609_v41 = vpop.f32.mrf.mxu2 }
 0x20d   : > { %v1838_v57 = vpop.f32.mrf.mxu3 }
 0x20e   : > { %v1839_v33 = vadd.f32 %v1838_v57, %v1609_v41  ;;  %v1571_v8 = vpop.f32.mrf.mxu0 }
 0x20f   : > { %v1800_v0 = vpop.f32.mrf.mxu1 }
 0x210   : > { %v1886_v59 = vadd.f32 %v3690_v38, %v1839_v33  ;;  %v1801_v20 = vadd.f32 %v1800_v0, %v1571_v8 }
 0x212   : > { %1919 = vst.msk [vmem:[%s2595_s11 + $0xc0] sm:$0xff] %vm1894_vm4, %v1886_v59  ;;  %v1871_v1 = vadd.f32 %v3690_v38, %v1801_v20 }
 0x214   : > { %1904 = vst.msk [vmem:[%s2595_s11 + $0x48] sm:$0xff] %vm1894_vm4, %v1871_v1  ;;  %v1611_v43 = vpop.f32.mrf.mxu2 }
 0x215   : > { %v1840_v5 = vpop.f32.mrf.mxu3 }
 0x216   : > { %v1841_v62 = vadd.f32 %v1840_v5, %v1611_v43  ;;  %v1574_v15 = vpop.f32.mrf.mxu0 }
 0x217   : > { %v1803_v55 = vpop.f32.mrf.mxu1 }
 0x218   : > { %v1887_v2 = vadd.f32 %v3690_v38, %v1841_v62  ;;  %v1804_v46 = vadd.f32 %v1803_v55, %v1574_v15 }
 0x21a   : > { %1920 = vst.msk [vmem:[%s2595_s11 + $0xc8] sm:$0xff] %vm1894_vm4, %v1887_v2  ;;  %v1872_v37 = vadd.f32 %v3690_v38, %v1804_v46 }
 0x21c   : > { %1905 = vst.msk [vmem:[%s2595_s11 + $0x50] sm:$0xff] %vm1894_vm4, %v1872_v37  ;;  %v1614_v51 = vpop.f32.mrf.mxu2 }
 0x21d   : > { %v1843_v27 = vpop.f32.mrf.mxu3 }
 0x21e   : > { %v1844_v19 = vadd.f32 %v1843_v27, %v1614_v51  ;;  %v1576_v7 = vpop.f32.mrf.mxu0 }
 0x21f   : > { %v1805_v36 = vpop.f32.mrf.mxu1 }
 0x220   : > { %v1888_v58 = vadd.f32 %v3690_v38, %v1844_v19  ;;  %v1806_v35 = vadd.f32 %v1805_v36, %v1576_v7 }
 0x222   : > { %1921 = vst.msk [vmem:[%s2595_s11 + $0xd0] sm:$0xff] %vm1894_vm4, %v1888_v58  ;;  %v1873_v3 = vadd.f32 %v3690_v38, %v1806_v35 }
 0x224   : > { %1906 = vst.msk [vmem:[%s2595_s11 + $0x58] sm:$0xff] %vm1894_vm4, %v1873_v3  ;;  %v1616_v40 = vpop.f32.mrf.mxu2 }
 0x225   : > { %v1845_v16 = vpop.f32.mrf.mxu3 }
 0x226   : > { %v1846_v17 = vadd.f32 %v1845_v16, %v1616_v40  ;;  %v1579_v4 = vpop.f32.mrf.mxu0 }
 0x227   : > { %v1808_v29 = vpop.f32.mrf.mxu1 }
 0x228   : > { %v1889_v61 = vadd.f32 %v3690_v38, %v1846_v17  ;;  %v1809_v11 = vadd.f32 %v1808_v29, %v1579_v4 }
 0x22a   : > { %1922 = vst.msk [vmem:[%s2595_s11 + $0xd8] sm:$0xff] %vm1894_vm4, %v1889_v61  ;;  %v1874_v42 = vadd.f32 %v3690_v38, %v1809_v11 }
 0x22c   : > { %1907 = vst.msk [vmem:[%s2595_s11 + $0x60] sm:$0xff] %vm1894_vm4, %v1874_v42  ;;  %v1619_v56 = vpop.f32.mrf.mxu2 }
 0x22d   : > { %v1848_v13 = vpop.f32.mrf.mxu3 }
 0x22e   : > { %v1849_v60 = vadd.f32 %v1848_v13, %v1619_v56  ;;  %v1581_v22 = vpop.f32.mrf.mxu0 }
 0x22f   : > { %v1810_v47 = vpop.f32.mrf.mxu1 }
 0x230   : > { %v1890_v44 = vadd.f32 %v3690_v38, %v1849_v60  ;;  %v1811_v10 = vadd.f32 %v1810_v47, %v1581_v22 }
 0x232   : > { %1923 = vst.msk [vmem:[%s2595_s11 + $0xe0] sm:$0xff] %vm1894_vm4, %v1890_v44  ;;  %v1875_v54 = vadd.f32 %v3690_v38, %v1811_v10 }
 0x234   : > { %1908 = vst.msk [vmem:[%s2595_s11 + $0x68] sm:$0xff] %vm1894_vm4, %v1875_v54  ;;  %v1621_v21 = vpop.f32.mrf.mxu2 }
 0x235   : > { %v1850_v12 = vpop.f32.mrf.mxu3 }
 0x236   : > { %v1851_v26 = vadd.f32 %v1850_v12, %v1621_v21  ;;  %v1584_v31 = vpop.f32.mrf.mxu0 }
 0x237   : > { %v1813_v32 = vpop.f32.mrf.mxu1 }
 0x238   : > { %v1891_v45 = vadd.f32 %v3690_v38, %v1851_v26  ;;  %v1814_v6 = vadd.f32 %v1813_v32, %v1584_v31 }
 0x23a   : > { %1924 = vst.msk [vmem:[%s2595_s11 + $0xe8] sm:$0xff] %vm1894_vm4, %v1891_v45  ;;  %v1876_v9 = vadd.f32 %v3690_v38, %v1814_v6 }
 0x23c   : > { %1909 = vst.msk [vmem:[%s2595_s11 + $0x70] sm:$0xff] %vm1894_vm4, %v1876_v9  ;;  %v1624_v28 = vpop.f32.mrf.mxu2 }
 0x23d   : > { %v1853_v34 = vpop.f32.mrf.mxu3 }
 0x23e   : > { %v1854_v53 = vadd.f32 %v1853_v34, %v1624_v28  ;;  %v1586_v24 = vpop.f32.mrf.mxu0 }
 0x23f   : > { %v1815_v23 = vpop.f32.mrf.mxu1 }
 0x240   : > { %v1892_v63 = vadd.f32 %v3690_v38, %v1854_v53  ;;  %v1816_v30 = vadd.f32 %v1815_v23, %v1586_v24 }
 0x242   : > { %1925 = vst.msk [vmem:[%s2595_s11 + $0xf0] sm:$0xff] %vm1894_vm4, %v1892_v63  ;;  %v1877_v25 = vadd.f32 %v3690_v38, %v1816_v30 }
 0x244   : > { %1910 = vst.msk [vmem:[%s2595_s11 + $0x78] sm:$0xff] %vm1894_vm4, %v1877_v25  ;;  %v1626_v14 = vpop.f32.mrf.mxu2 }
 0x245   : > { %v1855_v39 = vpop.f32.mrf.mxu3 }
 0x246   : > { %v1856_v52 = vadd.f32 %v1855_v39, %v1626_v14 }
 0x248   : > { %v1893_v48 = vadd.f32 %v3690_v38, %v1856_v52 }
 0x24a   : > { %1926 = vst.msk [vmem:[%s2595_s11 + $0xf8] sm:$0xff] %vm1894_vm4, %v1893_v48 }
 0x24b   : > { %2420 = shalt.err (!%p2417_p7)
}
 0x24c   : > { %s2492_s4 = smov 128   ;;  %s2493_s11 = smov 8  }
 0x24d   : > { %2316 = dma.vmem_to_hbm [thread:$0]  (%p2565_p3), %s1946_s27, 4096, %s1948_s28, %s1928_s29, %s2492_s4, %s2492_s4, %s2493_s11  }
 0x24e PF: > { %p2322_p9 = scmp.ge.s32.totalorder %s2487_s19, 2  ;;  %s1962_s21 = sand.u32 1, %s2459_s12  }
 0x24f   : > { %s1963_s15 = scalar_lea.sflag [#allocation4], %s1962_s21 }
 0x250   : > { %p2319_p10 = pnand %p2322_p9, %p2574_p8 }
 0x252   : > { %p2320_p11 = pneg %p2319_p10 }
 0x254   : > { %2454 = dma.done.wait (%p2320_p11), %s1963_s15, 4096  }
 0x255   : > { %2456 = vsyncadd (%p2320_p11), %s1963_s15, 4294963200  ;;  %s16_s19 = sadd.s32 1, %s2487_s19   ;;  %s3975_s12 = smov %s2463_s13 }
 0x256   : > { %p13_p12 = scmp.ge.s32.totalorder %s16_s19, 6   ;;  %s3976_s13 = smov %s2467_s14 }
 0x257   : > { %s3977_s14 = smov %s2583_s30  ;;  %s3978_s15 = smov %s2479_s17 }
 0x258   : > { %s3979_s16 = smov %s2483_s18  ;;  %s3980_s17 = smov %s3983_s22 }
 0x259   : > { %s3981_s18 = smov %s3987_s23  ;;  %15 = sbr.rel (!%p13_p12) target bundleno = 5 (0x5), region = 97 }
 0x25e   :  { %1969 = vsyncpa [#allocation4], 1 }
 0x25f   :  { %1971 = vsyncpa [#allocation4 + $0x1], 1 }

</bundles_post_ra>
